<compile_context>
chip_gen: v6e
topology: v6e:2x2x1
jax: 0.10.0
libtpu: 0.0.40
codegen_flags: <defaults>
</compile_context>

<pallas_src>
import functools

import jax
import jax.numpy as jnp
from jax.experimental import pallas as pl
from jax.experimental.pallas import tpu as pltpu


def _prelu(x, a):
    # PReLU(x) = x if x >= 0 else a * x  (matches PyTorch, including x == 0).
    return jnp.where(x >= 0, x, a * x)


def fcnn_kernel(x_ref,
                w1_ref, b1_ref, a1_ref,
                w2_ref, b2_ref, a2_ref,
                w3_ref, b3_ref, a3_ref,
                w4_ref, b4_ref,
                o_ref, *, bf16_epilogue):
    act_dt = jnp.bfloat16 if bf16_epilogue else jnp.float32

    # f32 -> bf16 cast in-kernel (cheap VPU op hidden under the MXU); the wrapper
    # never materializes a bf16 copy of x in HBM.
    x = x_ref[...].astype(jnp.bfloat16)

    # Layer 1: Linear(d_in -> 512).  bf16 MXU matmul, f32 accumulate.
    h = jnp.dot(x, w1_ref[...], preferred_element_type=jnp.float32)
    h = _prelu((h + b1_ref[...]).astype(act_dt), a1_ref[0].astype(act_dt))

    # Layer 2: Linear(512 -> 128) + PReLU.
    h = jnp.dot(h.astype(jnp.bfloat16), w2_ref[...],
                preferred_element_type=jnp.float32)
    h = _prelu((h + b2_ref[...]).astype(act_dt), a2_ref[0].astype(act_dt))

    # Layer 3: Linear(128 -> 16) + PReLU.  (tile_b, 16) is tiny -> keep f32.
    h = jnp.dot(h.astype(jnp.bfloat16), w3_ref[...],
                preferred_element_type=jnp.float32)
    h = _prelu(h + b3_ref[...], a3_ref[0])

    # Output layer: Linear(16 -> 1) on the VPU/XLU (broadcast mul + lane reduce);
    # avoids a degenerate 1-column MXU matmul.  w4 is (1, 16) f32, b4 SMEM scalar.
    o_ref[...] = (jnp.sum(h * w4_ref[...], axis=-1, keepdims=True)
                  + b4_ref[0]).astype(o_ref.dtype)


def _device_kind():
    try:
        return jax.devices()[0].device_kind.lower()
    except Exception:
        return ""


def _default_bf16_epilogue():
    # bf16 VPU path exists on v6e / v7x; v5e (and older) has no bf16 VALU -> keep f32.
    k = _device_kind()
    return any(tag in k for tag in ("v6", "v7", "tpu7"))


def _wants_even_grid_steps():
    # v7x has 2 TensorCores per chip; an even "parallel" step count keeps both fed.
    k = _device_kind()
    return any(tag in k for tag in ("v7", "tpu7"))


def _round_up(n, m):
    return -(-n // m) * m


def _pick_tiling(batch, tile_b_max):
    """Adaptive batch tile: multiple of 128, padding waste bounded to <128 rows/step."""
    tile_b_max = max(128, _round_up(tile_b_max, 128))
    n_steps = -(-batch // tile_b_max)
    if _wants_even_grid_steps():
        if batch >= 256:
            n_steps = max(n_steps, 2)
        if n_steps > 1 and n_steps % 2 == 1:
            n_steps += 1
    tile_b = _round_up(-(-batch // n_steps), 128)
    return n_steps, tile_b


def fcnn_forward(x, kparams, *, tile_b_max=2048, bf16_epilogue=None):
    """x: (B, input_dim) float32.  kparams: output of prepare_params()."""
    B, d_in = x.shape
    w1, b1, a1, w2, b2, a2, w3, b3, a3, w4, b4 = kparams
    h1, h2, h3 = w1.shape[1], w2.shape[1], w3.shape[1]
    out_dim = w4.shape[0]  # == 1

    if bf16_epilogue is None:
        bf16_epilogue = _default_bf16_epilogue()

    n_steps, tile_b = _pick_tiling(B, tile_b_max)
    b_pad = n_steps * tile_b

    x = x.astype(jnp.float32)
    if b_pad != B:
        x = jnp.pad(x, ((0, b_pad - B), (0, 0)))

    def vconst(shape):
        # Full-array block, constant index map -> stays resident in VMEM.
        return pl.BlockSpec(shape, lambda i: (0, 0))

    smem = pl.BlockSpec(memory_space=pltpu.MemorySpace.SMEM)

    in_specs = [
        pl.BlockSpec((tile_b, d_in), lambda i: (i, 0)),   # x (batch-tiled, f32)
        vconst((d_in, h1)), vconst((1, h1)), smem,        # w1, b1, a1
        vconst((h1, h2)),  vconst((1, h2)), smem,         # w2, b2, a2
        vconst((h2, h3)),  vconst((1, h3)), smem,         # w3, b3, a3
        vconst((out_dim, h3)), smem,                      # w4, b4
    ]

    flops = 2 * b_pad * (d_in * h1 + h1 * h2 + h2 * h3 + h3 * out_dim)
    bytes_accessed = (b_pad * d_in * 4
                      + sum(int(p.size) * p.dtype.itemsize for p in kparams)
                      + b_pad * out_dim * 4)

    kernel = functools.partial(fcnn_kernel, bf16_epilogue=bf16_epilogue)

    out = pl.pallas_call(
        kernel,
        out_shape=jax.ShapeDtypeStruct((b_pad, out_dim), jnp.float32),
        grid=(n_steps,),
        in_specs=in_specs,
        out_specs=pl.BlockSpec((tile_b, out_dim), lambda i: (i, 0)),
        compiler_params=pltpu.CompilerParams(
            dimension_semantics=("parallel",),
            vmem_limit_bytes=32 * 1024 * 1024),
        cost_estimate=pl.CostEstimate(flops=flops, transcendentals=0,
                                      bytes_accessed=bytes_accessed),
    )(x, *kparams)

    return out[:B]


def init_params(key, input_dim, hidden_dims=(512, 128, 16), output_dim=1):
    """PyTorch-style uniform(-1/sqrt(fan_in), 1/sqrt(fan_in)) init, f32,
    weights already in (in_features, out_features) layout."""
    dims = [input_dim] + list(hidden_dims) + [output_dim]
    params = []
    for i in range(len(dims) - 1):
        fan_in, fan_out = dims[i], dims[i + 1]
        key, kw, kb = jax.random.split(key, 3)
        bound = 1.0 / float(fan_in) ** 0.5
        w = jax.random.uniform(kw, (fan_in, fan_out), jnp.float32, -bound, bound)
        b = jax.random.uniform(kb, (1, fan_out), jnp.float32, -bound, bound)
        params.append(w)
        params.append(b)
        if i < len(dims) - 2:  # PReLU after every hidden Linear, not the output one
            params.append(jnp.full((1,), 0.25, dtype=jnp.float32))
    return params


def prepare_params(params):
    """Cast matmul weights to bf16, keep biases/slopes f32, reshape the tail layer
    for the VPU path (w4 -> (out_dim, 16), b4 -> (out_dim,) SMEM scalar)."""
    w1, b1, a1, w2, b2, a2, w3, b3, a3, w4, b4 = params
    return [
        w1.astype(jnp.bfloat16), b1, a1,
        w2.astype(jnp.bfloat16), b2, a2,
        w3.astype(jnp.bfloat16), b3, a3,
        jnp.transpose(w4),        # (16, 1) -> (1, 16), f32
        b4.reshape(-1),           # (1, 1)  -> (1,),    f32 (SMEM scalar)
    ]


def fcnn_reference(x, kparams, *, bf16_epilogue):
    """Pure-JAX reference mirroring the kernel math exactly."""
    w1, b1, a1, w2, b2, a2, w3, b3, a3, w4, b4 = kparams
    act_dt = jnp.bfloat16 if bf16_epilogue else jnp.float32
    h = jnp.dot(x.astype(jnp.bfloat16), w1, preferred_element_type=jnp.float32)
    h = _prelu((h + b1).astype(act_dt), a1[0].astype(act_dt))
    h = jnp.dot(h.astype(jnp.bfloat16), w2, preferred_element_type=jnp.float32)
    h = _prelu((h + b2).astype(act_dt), a2[0].astype(act_dt))
    h = jnp.dot(h.astype(jnp.bfloat16), w3, preferred_element_type=jnp.float32)
    h = _prelu(h + b3, a3[0])
    return jnp.sum(h * w4, axis=-1, keepdims=True) + b4[0]


if __name__ == "__main__":
    key = jax.random.PRNGKey(0)
    key, kx, kx2 = jax.random.split(key, 3)

    batch, input_dim = 8, 32
    x = jax.random.normal(kx, (batch, input_dim), dtype=jnp.float32)

    params = init_params(key, input_dim, hidden_dims=(512, 128, 16), output_dim=1)
    kparams = prepare_params(params)
    bf16_epi = _default_bf16_epilogue()

    # Small-batch check (single grid step, padded to one 128-row tile).
    out = fcnn_forward(x, kparams)
    out = jax.block_until_ready(out)
    ref = fcnn_reference(x, kparams, bf16_epilogue=bf16_epi)
    assert out.shape == (batch, 1)
    assert jnp.allclose(out, ref, rtol=2e-3, atol=2e-3), "mismatch vs reference (B=8)"

    # Multi-tile check: B=300 with tile_b_max=256 exercises the multi-step grid
    # (2 steps of 256 rows) and the padding/slice path.
    batch2 = 300
    x2 = jax.random.normal(kx2, (batch2, input_dim), dtype=jnp.float32)
    out2 = fcnn_forward(x2, kparams, tile_b_max=256)
    out2 = jax.block_until_ready(out2)
    ref2 = fcnn_reference(x2, kparams, bf16_epilogue=bf16_epi)
    assert out2.shape == (batch2, 1)
    assert jnp.allclose(out2, ref2, rtol=2e-3, atol=2e-3), "mismatch vs reference (B=300)"

    print("KERNEL_OK")
</pallas_src>

<mosaic_0001>
module attributes {stable_mosaic.version = 11 : i64} {
  func.func @fcnn_kernel(%arg0: i32, %arg1: memref<128x32xf32, #tpu.memory_space<vmem>>, %arg2: memref<32x512xbf16, #tpu.memory_space<vmem>>, %arg3: memref<1x512xf32, #tpu.memory_space<vmem>>, %arg4: memref<1xf32, #tpu.memory_space<smem>>, %arg5: memref<512x128xbf16, #tpu.memory_space<vmem>>, %arg6: memref<1x128xf32, #tpu.memory_space<vmem>>, %arg7: memref<1xf32, #tpu.memory_space<smem>>, %arg8: memref<128x16xbf16, #tpu.memory_space<vmem>>, %arg9: memref<1x16xf32, #tpu.memory_space<vmem>>, %arg10: memref<1xf32, #tpu.memory_space<smem>>, %arg11: memref<1x16xf32, #tpu.memory_space<vmem>>, %arg12: memref<1xf32, #tpu.memory_space<smem>>, %arg13: memref<128x1xf32, #tpu.memory_space<vmem>>) attributes {dimension_semantics = [#tpu.dimension_semantics<parallel>], iteration_bounds = array<i64: 1>, scalar_prefetch = 0 : i64, scratch_operands = 0 : i64, tpu.core_type = #tpu.core_type<tc>, window_params = [{transform_indices = @transform_0, window_bounds = array<i64: 128, 32>}, {pipeline_mode = #tpu.pipeline_mode<synchronous>, transform_indices = @transform_1, window_bounds = array<i64: 32, 512>}, {pipeline_mode = #tpu.pipeline_mode<synchronous>, transform_indices = @transform_2, window_bounds = array<i64: 1, 512>}, {transform_indices = @transform_3, window_bounds = array<i64: 1>}, {pipeline_mode = #tpu.pipeline_mode<synchronous>, transform_indices = @transform_4, window_bounds = array<i64: 512, 128>}, {pipeline_mode = #tpu.pipeline_mode<synchronous>, transform_indices = @transform_5, window_bounds = array<i64: 1, 128>}, {transform_indices = @transform_6, window_bounds = array<i64: 1>}, {pipeline_mode = #tpu.pipeline_mode<synchronous>, transform_indices = @transform_7, window_bounds = array<i64: 128, 16>}, {pipeline_mode = #tpu.pipeline_mode<synchronous>, transform_indices = @transform_8, window_bounds = array<i64: 1, 16>}, {transform_indices = @transform_9, window_bounds = array<i64: 1>}, {pipeline_mode = #tpu.pipeline_mode<synchronous>, transform_indices = @transform_10, window_bounds = array<i64: 1, 16>}, {transform_indices = @transform_11, window_bounds = array<i64: 1>}, {transform_indices = @transform_12, window_bounds = array<i64: 128, 1>}]} {
    %c0 = arith.constant 0 : index
    %c0_0 = arith.constant 0 : index
    %0 = vector.load %arg1[%c0, %c0_0] : memref<128x32xf32, #tpu.memory_space<vmem>>, vector<128x32xf32>
    %1 = arith.truncf %0 : vector<128x32xf32> to vector<128x32xbf16>
    %c0_1 = arith.constant 0 : index
    %c0_2 = arith.constant 0 : index
    %2 = vector.load %arg2[%c0_1, %c0_2] : memref<32x512xbf16, #tpu.memory_space<vmem>>, vector<32x512xbf16>
    %cst = arith.constant dense<0.000000e+00> : vector<128x512xf32>
    %3 = tpu.matmul %1, %2, %cst {dimension_numbers = #tpu.dot_dimension_numbers<[1], [0], [0], [1], [0, 0, 1, 1], [], []>} : vector<128x32xbf16>, vector<32x512xbf16>, vector<128x512xf32> -> vector<128x512xf32>
    %c0_3 = arith.constant 0 : index
    %c0_4 = arith.constant 0 : index
    %4 = vector.load %arg3[%c0_3, %c0_4] : memref<1x512xf32, #tpu.memory_space<vmem>>, vector<1x512xf32>
    %5 = vector.broadcast %4 : vector<1x512xf32> to vector<128x512xf32>
    %6 = arith.addf %3, %5 : vector<128x512xf32>
    %c0_5 = arith.constant 0 : index
    %7 = memref.load %arg4[%c0_5] : memref<1xf32, #tpu.memory_space<smem>>
    %cst_6 = arith.constant 0.000000e+00 : f32
    %8 = vector.broadcast %cst_6 : f32 to vector<128x512xf32>
    %9 = arith.cmpf oge, %6, %8 : vector<128x512xf32>
    %10 = vector.broadcast %7 : f32 to vector<128x512xf32>
    %11 = arith.mulf %10, %6 : vector<128x512xf32>
    %12 = arith.select %9, %6, %11 : vector<128x512xi1>, vector<128x512xf32>
    %13 = arith.truncf %12 : vector<128x512xf32> to vector<128x512xbf16>
    %c0_7 = arith.constant 0 : index
    %c0_8 = arith.constant 0 : index
    %14 = vector.load %arg5[%c0_7, %c0_8] : memref<512x128xbf16, #tpu.memory_space<vmem>>, vector<512x128xbf16>
    %cst_9 = arith.constant dense<0.000000e+00> : vector<128x128xf32>
    %15 = tpu.matmul %13, %14, %cst_9 {dimension_numbers = #tpu.dot_dimension_numbers<[1], [0], [0], [1], [0, 0, 1, 1], [], []>} : vector<128x512xbf16>, vector<512x128xbf16>, vector<128x128xf32> -> vector<128x128xf32>
    %c0_10 = arith.constant 0 : index
    %c0_11 = arith.constant 0 : index
    %16 = vector.load %arg6[%c0_10, %c0_11] : memref<1x128xf32, #tpu.memory_space<vmem>>, vector<1x128xf32>
    %17 = vector.broadcast %16 : vector<1x128xf32> to vector<128x128xf32>
    %18 = arith.addf %15, %17 : vector<128x128xf32>
    %c0_12 = arith.constant 0 : index
    %19 = memref.load %arg7[%c0_12] : memref<1xf32, #tpu.memory_space<smem>>
    %cst_13 = arith.constant 0.000000e+00 : f32
    %20 = vector.broadcast %cst_13 : f32 to vector<128x128xf32>
    %21 = arith.cmpf oge, %18, %20 : vector<128x128xf32>
    %22 = vector.broadcast %19 : f32 to vector<128x128xf32>
    %23 = arith.mulf %22, %18 : vector<128x128xf32>
    %24 = arith.select %21, %18, %23 : vector<128x128xi1>, vector<128x128xf32>
    %25 = arith.truncf %24 : vector<128x128xf32> to vector<128x128xbf16>
    %c0_14 = arith.constant 0 : index
    %c0_15 = arith.constant 0 : index
    %26 = vector.load %arg8[%c0_14, %c0_15] : memref<128x16xbf16, #tpu.memory_space<vmem>>, vector<128x16xbf16>
    %cst_16 = arith.constant dense<0.000000e+00> : vector<128x16xf32>
    %27 = tpu.matmul %25, %26, %cst_16 {dimension_numbers = #tpu.dot_dimension_numbers<[1], [0], [0], [1], [0, 0, 1, 1], [], []>} : vector<128x128xbf16>, vector<128x16xbf16>, vector<128x16xf32> -> vector<128x16xf32>
    %c0_17 = arith.constant 0 : index
    %c0_18 = arith.constant 0 : index
    %28 = vector.load %arg9[%c0_17, %c0_18] : memref<1x16xf32, #tpu.memory_space<vmem>>, vector<1x16xf32>
    %29 = vector.broadcast %28 : vector<1x16xf32> to vector<128x16xf32>
    %30 = arith.addf %27, %29 : vector<128x16xf32>
    %c0_19 = arith.constant 0 : index
    %31 = memref.load %arg10[%c0_19] : memref<1xf32, #tpu.memory_space<smem>>
    %cst_20 = arith.constant 0.000000e+00 : f32
    %32 = vector.broadcast %cst_20 : f32 to vector<128x16xf32>
    %33 = arith.cmpf oge, %30, %32 : vector<128x16xf32>
    %34 = vector.broadcast %31 : f32 to vector<128x16xf32>
    %35 = arith.mulf %34, %30 : vector<128x16xf32>
    %36 = arith.select %33, %30, %35 : vector<128x16xi1>, vector<128x16xf32>
    %c0_21 = arith.constant 0 : index
    %c0_22 = arith.constant 0 : index
    %37 = vector.load %arg11[%c0_21, %c0_22] : memref<1x16xf32, #tpu.memory_space<vmem>>, vector<1x16xf32>
    %38 = vector.broadcast %37 : vector<1x16xf32> to vector<128x16xf32>
    %39 = arith.mulf %36, %38 : vector<128x16xf32>
    %cst_23 = arith.constant dense<0.000000e+00> : vector<128xf32>
    %40 = vector.multi_reduction <add>, %39, %cst_23 [1] : vector<128x16xf32> to vector<128xf32>
    %41 = vector.shape_cast %40 : vector<128xf32> to vector<128x1xf32>
    %c0_24 = arith.constant 0 : index
    %42 = memref.load %arg12[%c0_24] : memref<1xf32, #tpu.memory_space<smem>>
    %43 = vector.broadcast %42 : f32 to vector<128x1xf32>
    %44 = arith.addf %41, %43 : vector<128x1xf32>
    %c0_25 = arith.constant 0 : index
    %c0_26 = arith.constant 0 : index
    %45 = vector.load %arg13[%c0_25, %c0_26] : memref<128x1xf32, #tpu.memory_space<vmem>>, vector<128x1xf32>
    tpu.vector_store %arg13[%c0_25, %c0_26], %44 {strides = array<i32>} : memref<128x1xf32, #tpu.memory_space<vmem>>, vector<128x1xf32>,
    return
  }
  func.func @transform_0(%arg0: i32) -> (i32, i32) {
    %c0_i32 = arith.constant 0 : i32
    %c0_i32_0 = arith.constant 0 : i32
    return %arg0, %c0_i32 : i32, i32
  }
  func.func @transform_1(%arg0: i32) -> (i32, i32) {
    %c0_i32 = arith.constant 0 : i32
    %c0_i32_0 = arith.constant 0 : i32
    %c0_i32_1 = arith.constant 0 : i32
    return %c0_i32, %c0_i32_0 : i32, i32
  }
  func.func @transform_2(%arg0: i32) -> (i32, i32) {
    %c0_i32 = arith.constant 0 : i32
    %c0_i32_0 = arith.constant 0 : i32
    %c0_i32_1 = arith.constant 0 : i32
    return %c0_i32, %c0_i32_0 : i32, i32
  }
  func.func @transform_3(%arg0: i32) -> i32 {
    %c0_i32 = arith.constant 0 : i32
    %c0_i32_0 = arith.constant 0 : i32
    return %c0_i32 : i32
  }
  func.func @transform_4(%arg0: i32) -> (i32, i32) {
    %c0_i32 = arith.constant 0 : i32
    %c0_i32_0 = arith.constant 0 : i32
    %c0_i32_1 = arith.constant 0 : i32
    return %c0_i32, %c0_i32_0 : i32, i32
  }
  func.func @transform_5(%arg0: i32) -> (i32, i32) {
    %c0_i32 = arith.constant 0 : i32
    %c0_i32_0 = arith.constant 0 : i32
    %c0_i32_1 = arith.constant 0 : i32
    return %c0_i32, %c0_i32_0 : i32, i32
  }
  func.func @transform_6(%arg0: i32) -> i32 {
    %c0_i32 = arith.constant 0 : i32
    %c0_i32_0 = arith.constant 0 : i32
    return %c0_i32 : i32
  }
  func.func @transform_7(%arg0: i32) -> (i32, i32) {
    %c0_i32 = arith.constant 0 : i32
    %c0_i32_0 = arith.constant 0 : i32
    %c0_i32_1 = arith.constant 0 : i32
    return %c0_i32, %c0_i32_0 : i32, i32
  }
  func.func @transform_8(%arg0: i32) -> (i32, i32) {
    %c0_i32 = arith.constant 0 : i32
    %c0_i32_0 = arith.constant 0 : i32
    %c0_i32_1 = arith.constant 0 : i32
    return %c0_i32, %c0_i32_0 : i32, i32
  }
  func.func @transform_9(%arg0: i32) -> i32 {
    %c0_i32 = arith.constant 0 : i32
    %c0_i32_0 = arith.constant 0 : i32
    return %c0_i32 : i32
  }
  func.func @transform_10(%arg0: i32) -> (i32, i32) {
    %c0_i32 = arith.constant 0 : i32
    %c0_i32_0 = arith.constant 0 : i32
    %c0_i32_1 = arith.constant 0 : i32
    return %c0_i32, %c0_i32_0 : i32, i32
  }
  func.func @transform_11(%arg0: i32) -> i32 {
    %c0_i32 = arith.constant 0 : i32
    %c0_i32_0 = arith.constant 0 : i32
    return %c0_i32 : i32
  }
  func.func @transform_12(%arg0: i32) -> (i32, i32) {
    %c0_i32 = arith.constant 0 : i32
    %c0_i32_0 = arith.constant 0 : i32
    return %arg0, %c0_i32 : i32, i32
  }
}

</mosaic_0001>

<bundles_post_ra>
// kernel: tpu_custom_call.1
= control target key start
LH: loop header
LB: loop body
LE: loop exit
PB: predicated region body
PF: predicated region fallthrough
CT: control target
= control target key end

     0   :  { %21 = vsyncpa [#allocation7], 0  ;;  %s1801_s21 = smov [#allocation6]   ;;  %s2501_s0 = inlined_call_operand.vmem [shape: f32[128,32], index: 0, kind: input, shape index: {}]   ;;  %s2502_s1 = inlined_call_operand.vmem [shape: bf16[32,512], index: 1, kind: input, shape index: {}]   ;;  %s2503_s2 = inlined_call_operand.vmem [shape: f32[1,512], index: 2, kind: input, shape index: {}]   ;;  %s2504_s3 = inlined_call_operand.<no memory space> [shape: f32[1], index: 3, kind: input, shape index: {}]   ;;  %s2505_s4 = inlined_call_operand.hbm [shape: bf16[512,128], index: 4, kind: input, shape index: {}]   ;;  %s2506_s5 = inlined_call_operand.vmem [shape: f32[1,128], index: 5, kind: input, shape index: {}]   ;;  %s2507_s6 = inlined_call_operand.<no memory space> [shape: f32[1], index: 6, kind: input, shape index: {}]   ;;  %s2508_s7 = inlined_call_operand.vmem [shape: bf16[128,16], index: 7, kind: input, shape index: {}]   ;;  %s2509_s8 = inlined_call_operand.vmem [shape: f32[1,16], index: 8, kind: input, shape index: {}]   ;;  %s2510_s9 = inlined_call_operand.<no memory space> [shape: f32[1], index: 9, kind: input, shape index: {}]   ;;  %s2511_s10 = inlined_call_operand.vmem [shape: f32[1,16], index: 10, kind: input, shape index: {}]   ;;  %s2512_s11 = inlined_call_operand.<no memory space> [shape: f32[1], index: 11, kind: input, shape index: {}]   ;;  %s2513_s12 = inlined_call_operand.vmem [shape: f32[128,1], index: 12, kind: output, shape index: {}]  }
   0x1   :  { %s35_s22 = sshll.u32 %s1801_s21, 4  ;;  %s36_s22 = int_to_ptr.vmem [resolvable:$true] %s35_s22 }
   0x2   :  { %s1787_s23 = scalar_lea.vmem %s36_s22, 4096  ;;  %p1792_p1 = scmp.lt.s32.totalorder %s36_s22, %s36_s22 }
   0x3   :  { %p1788_p0 = scmp.ne.s32.totalorder %s36_s22, %s1787_s23  ;;  %p1793_p2 = scmp.lt.s32.totalorder %s1787_s23, %s1787_s23 }
   0x5   :  { %p1794_p3 = por %p1793_p2, %p1792_p1 }
   0x7   :  { %p1795_p4 = pnand %p1794_p3, %p1788_p0 }
   0x9   :  { %1798 = shalt.err (!%p1795_p4)
}
   0xa   :  { %s1802_s24 = smov 64   ;;  %s1803_s25 = smov 4  }
   0xb   :  { %41 = dma.hbm_to_vmem [thread:$0]  %s2505_s4, 4096, %s36_s22, [#allocation7], %s1802_s24, %s1802_s24, %s1803_s25  }
   0xc   :  { %1799 = dma.done.wait [#allocation7], 4096  }
   0xd   :  { %1800 = vsyncadd [#allocation7], 4294963200  ;;  %v1804_v0 = vmov 0   ;;  %v1727_v1 = vld [vmem:[%s2502_s1 + $0x24] ss:$16 sps:$4 sm:$0xff]   ;;  %v61_v6 = vld [vmem:[%s2501_s0 + $0x8] sm:$0xff] }
   0xe   :  { %211 = vmatprep.mubr.bf16.mxu0 %v1804_v0  ;;  %271 = vmatprep.mubr.bf16.mxu1 %v1804_v0  ;;  %v1729_v2 = vld [vmem:[%s2502_s1 + $0x20] ss:$16 sps:$4 sm:$0xff]   ;;  %v1730_v3 = vld [vmem:[%s2502_s1 + $0x4] ss:$16 sps:$4 sm:$0xff]   ;;  %v73_v8 = vld [vmem:[%s2501_s0 + $0x68] sm:$0xff]  ;;  %vm154_vm0 = vcmask 261120  }
   0xf   :  { %191 = vmatprep.subr.bf16.mxu0 %v1727_v1  ;;  %1719 = vmatprep.subr.bf16.mxu1 %v1727_v1  ;;  %v1732_v4 = vld [vmem:[%s2502_s1] ss:$16 sps:$4 sm:$0xff]   ;;  %v1735_v9 = vld [vmem:[%s2502_s1 + $0x2c] ss:$16 sps:$4 sm:$0xff]   ;;  %v1733_v12 = vld [vmem:[%s2502_s1 + $0x28] ss:$16 sps:$4 sm:$0xff]   ;;  %v94_v1 = vlaneseq }
  0x10   :  { %v60_v5 = vld [vmem:[%s2501_s0] sm:$0xff]  ;;  %192 = vmatpush1.bf16.msra.mxu0 %v1729_v2  ;;  %1721 = vmatpush1.bf16.msra.mxu1 %v1729_v2  ;;  %v1738_v13 = vld [vmem:[%s2502_s1 + $0xc] ss:$16 sps:$4 sm:$0xff]   ;;  %v62_v14 = vld [vmem:[%s2501_s0 + $0x10] sm:$0xff] }
  0x11   :  { %v72_v7 = vld [vmem:[%s2501_s0 + $0x60] sm:$0xff]  ;;  %193 = vmatprep.subr.bf16.mxu0 %v1730_v3  ;;  %1720 = vmatprep.subr.bf16.mxu1 %v1730_v3  ;;  %v76_v10 = vpack.c.bf16 %v61_v6, %v60_v5  ;;  %v63_v15 = vld [vmem:[%s2501_s0 + $0x18] sm:$0xff]  ;;  %v74_v16 = vld [vmem:[%s2501_s0 + $0x70] sm:$0xff]  ;;  %v95_v2 = vshrl.u32 %v94_v1, 7 }
  0x12   :  { %v1902_v11 = vpack.c.bf16 %v73_v8, %v72_v7  ;;  %v75_v17 = vld [vmem:[%s2501_s0 + $0x78] sm:$0xff]  ;;  %v77_v20 = vpack.c.bf16 %v63_v15, %v62_v14  ;;  %v64_v24 = vld [vmem:[%s2501_s0 + $0x20] sm:$0xff]  ;;  %v65_v25 = vld [vmem:[%s2501_s0 + $0x28] sm:$0xff] }
  0x13   :  { %v1736_v18 = vld [vmem:[%s2502_s1 + $0x8] ss:$16 sps:$4 sm:$0xff]   ;;  %v1930_v21 = vpack.c.bf16 %v75_v17, %v74_v16  ;;  %v1747_v26 = vld [vmem:[#allocation6 + $0x70] sm:$0xff]   ;;  %v78_v29 = vpack.c.bf16 %v65_v25, %v64_v24  ;;  %v1753_v35 = vld [vmem:[#allocation6 + $0x60] sm:$0xff]   ;;  %v96_v3 = vsub.s32 0, %v95_v2  ;;  %v100_v5 = vsub.s32 1, %v95_v2 }
  0x14   :  { %194 = vmatpush1.bf16.msra.mxu0 %v1732_v4  ;;  %1722 = vmatpush1.bf16.msra.mxu1 %v1732_v4  ;;  %v1739_v19 = vld [vmem:[#allocation6 + $0xf8] sm:$0xff]   ;;  %v1748_v27 = vld [vmem:[#allocation6 + $0x30] sm:$0xff]   ;;  %v1749_v28 = vld [vmem:[#allocation6 + $0x68] sm:$0xff]  }
  0x15   :  { %304 = vmatprep.subr.bf16.mxu1 %v1735_v9  ;;  %v1743_v22 = vld [vmem:[#allocation6 + $0x78] sm:$0xff]   ;;  %v1741_v31 = vld [vmem:[#allocation6 + $0xf0] sm:$0xff]   ;;  %v1751_v32 = vld [vmem:[#allocation6 + $0x28] sm:$0xff]  }
  0x16   :  { %v1744_v23 = vld [vmem:[#allocation6 + $0x38] sm:$0xff]   ;;  %1543 = vmatprep.subr.bf16.mxu0 %v1743_v22  ;;  %v66_v33 = vld [vmem:[%s2501_s0 + $0x30] sm:$0xff]  ;;  %v1745_v37 = vld [vmem:[#allocation6 + $0xe8] sm:$0xff]  }
  0x17   :  { %1484 = vmatmul.mubr.msk.bf16.vlgmr.msra.gmra.mxu0 %vm154_vm0, %v76_v10  ;;  %1490 = vmatmul.mubr.msk.bf16.vlgmr.msra.gmra.mxu1 %vm154_vm0, %v1902_v11  ;;  %v1740_v30 = vld [vmem:[#allocation6 + $0xb8] sm:$0xff]   ;;  %v1742_v36 = vld [vmem:[#allocation6 + $0xb0] sm:$0xff]   ;;  %v1754_v38 = vld [vmem:[#allocation6 + $0x20] sm:$0xff]  }
  0x18   :  { %305 = vmatpush1.bf16.msra.mxu1 %v1733_v12  ;;  %221 = vmatprep.mubr.bf16.mxu0 %v1804_v0  ;;  %v67_v34 = vld [vmem:[%s2501_s0 + $0x38] sm:$0xff]  ;;  %v1746_v41 = vld [vmem:[#allocation6 + $0xa8] sm:$0xff]   ;;  %v1750_v42 = vld [vmem:[#allocation6 + $0xe0] sm:$0xff]  }
  0x19   :  { %281 = vmatprep.mubr.bf16.mxu1 %v1804_v0  ;;  %306 = vmatprep.subr.bf16.mxu1 %v1738_v13  ;;  %v1755_v39 = vld [vmem:[#allocation6 + $0x58] sm:$0xff]   ;;  %v79_v40 = vpack.c.bf16 %v67_v34, %v66_v33  ;;  %v68_v43 = vld [vmem:[%s2501_s0 + $0x40] sm:$0xff]  ;;  %v69_v44 = vld [vmem:[%s2501_s0 + $0x48] sm:$0xff]  ;;  %v1996_v13 = vstv %s2504_s3  ;;  %v104_v33 = vsub.s32 2, %v95_v2 }
  0x1a   :  { %1544 = vmatpush3.bf16.msra.mxu0 %v1744_v23  ;;  %v1752_v45 = vld [vmem:[#allocation6 + $0xa0] sm:$0xff]   ;;  %v1756_v46 = vld [vmem:[#allocation6 + $0xd8] sm:$0xff]   ;;  %v80_v47 = vpack.c.bf16 %v69_v44, %v68_v43  ;;  %v70_v48 = vld [vmem:[%s2501_s0 + $0x50] sm:$0xff] }
  0x1b   :  { %1545 = vmatprep.subr.bf16.mxu0 %v1747_v26  ;;  %v71_v49 = vld [vmem:[%s2501_s0 + $0x58] sm:$0xff]  ;;  %v1759_v52 = vld [vmem:[#allocation6 + $0x50] sm:$0xff]   ;;  %v1761_v55 = vld [vmem:[#allocation6 + $0x48] sm:$0xff]  }
  0x1c   :  { %307 = vmatpush1.bf16.msra.mxu1 %v1736_v18  ;;  %v81_v50 = vpack.c.bf16 %v71_v49, %v70_v48  ;;  %v1757_v51 = vld [vmem:[#allocation6 + $0x18] sm:$0xff]   ;;  %v1760_v53 = vld [vmem:[#allocation6 + $0x10] sm:$0xff]   ;;  %v1763_v56 = vld [vmem:[#allocation6 + $0x8] sm:$0xff]  }
  0x1d   :  { %1607 = vmatprep.subr.bf16.mxu1 %v1739_v19  ;;  %v1758_v54 = vld [vmem:[#allocation6 + $0x98] sm:$0xff]   ;;  %v1762_v57 = vld [vmem:[#allocation6 + $0xd0] sm:$0xff]   ;;  %v1765_v58 = vld [vmem:[#allocation6 + $0x40] sm:$0xff]  }
  0x1e   :  { %1546 = vmatpush3.bf16.msra.mxu0 %v1748_v27  ;;  %v1764_v59 = vld [vmem:[#allocation6 + $0x90] sm:$0xff]   ;;  %v1766_v60 = vld [vmem:[#allocation6] sm:$0xff]   ;;  %v1767_v61 = vld [vmem:[#allocation6 + $0xc8] sm:$0xff]  }
  0x1f   :  { %1485 = vmatmul.mubr.msk.bf16.gmra.mxu0 %vm154_vm0, %v77_v20  ;;  %1491 = vmatmul.mubr.msk.bf16.gmra.mxu1 %vm154_vm0, %v1930_v21  ;;  %v1768_v62 = vld [vmem:[#allocation6 + $0x88] sm:$0xff]   ;;  %v1769_v63 = vld [vmem:[#allocation6 + $0xc0] sm:$0xff]  }
  0x20   :  { %231 = vmatprep.mubr.bf16.mxu0 %v1804_v0  ;;  %324 = vmatprep.mubr.bf16.mxu1 %v1804_v0  ;;  %v92_v4 = vld [vmem:[%s2503_s2] sm:$0xf] }
  0x21   :  { %1547 = vmatprep.subr.bf16.mxu0 %v1749_v28  ;;  %v1988_v6 = vrot.slane %v92_v4, %v96_v3 }
  0x22   :  { %1548 = vmatpush3.bf16.msra.mxu0 %v1751_v32 }
  0x23   :  { %1549 = vmatprep.subr.bf16.mxu0 %v1753_v35 }
  0x26   :  { %1550 = vmatpush3.bf16.msra.mxu0 %v1754_v38 }
  0x27   :  { %1486 = vmatmul.mubr.msk.bf16.gmra.mxu0 %vm154_vm0, %v78_v29  ;;  %1492 = vmatmul.mubr.msk.bf16.vlgmr.msra.gmra.mxu1 %vm154_vm0, %v76_v10  ;;  %v1991_v10 = vrot.slane %v92_v4, %v100_v5 }
  0x28   :  { %241 = vmatprep.mubr.bf16.mxu0 %v1804_v0  ;;  %334 = vmatprep.mubr.bf16.mxu1 %v1804_v0 }
  0x29   :  { %1608 = vmatpush3.bf16.msra.mxu1 %v1740_v30  ;;  %1551 = vmatprep.subr.bf16.mxu0 %v1755_v39 }
  0x2a   :  { %1609 = vmatprep.subr.bf16.mxu1 %v1741_v31  ;;  %1552 = vmatpush3.bf16.msra.mxu0 %v1757_v51 }
  0x2b   :  { %1553 = vmatprep.subr.bf16.mxu0 %v1759_v52 }
  0x2d   :  { %1610 = vmatpush3.bf16.msra.mxu1 %v1742_v36 }
  0x2e   :  { %1611 = vmatprep.subr.bf16.mxu1 %v1745_v37  ;;  %1554 = vmatpush3.bf16.msra.mxu0 %v1760_v53 }
  0x2f   :  { %1487 = vmatmul.mubr.msk.bf16.gmra.mxu0 %vm154_vm0, %v79_v40  ;;  %1493 = vmatmul.mubr.msk.bf16.gmra.mxu1 %vm154_vm0, %v77_v20 }
  0x30   :  { %251 = vmatprep.mubr.bf16.mxu0 %v1804_v0  ;;  %344 = vmatprep.mubr.bf16.mxu1 %v1804_v0 }
  0x31   :  { %1612 = vmatpush3.bf16.msra.mxu1 %v1746_v41  ;;  %1555 = vmatprep.subr.bf16.mxu0 %v1761_v55 }
  0x32   :  { %1613 = vmatprep.subr.bf16.mxu1 %v1750_v42  ;;  %1556 = vmatpush3.bf16.msra.mxu0 %v1763_v56  ;;  %v108_v42 = vsub.s32 3, %v95_v2 }
  0x33   :  { %1557 = vmatprep.subr.bf16.mxu0 %v1765_v58 }
  0x35   :  { %1614 = vmatpush3.bf16.msra.mxu1 %v1752_v45 }
  0x36   :  { %1615 = vmatprep.subr.bf16.mxu1 %v1756_v46  ;;  %1558 = vmatpush3.bf16.msra.mxu0 %v1766_v60  ;;  %v2016_v46 = vrot.slane %v92_v4, %v104_v33 }
  0x37   :  { %1488 = vmatmul.mubr.msk.bf16.gmra.mxu0 %vm154_vm0, %v80_v47  ;;  %1494 = vmatmul.mubr.msk.bf16.gmra.mxu1 %vm154_vm0, %v78_v29 }
  0x38   :  { %261 = vmatprep.mubr.bf16.mxu0 %v1804_v0  ;;  %354 = vmatprep.mubr.bf16.mxu1 %v1804_v0 }
  0x39   :  { %1616 = vmatpush3.bf16.msra.mxu1 %v1758_v54  ;;  %v2029_v54 = vrot.slane %v92_v4, %v108_v42 }
  0x3a   :  { %1617 = vmatprep.subr.bf16.mxu1 %v1762_v57 }
  0x3d   :  { %1618 = vmatpush3.bf16.msra.mxu1 %v1764_v59 }
  0x3e   :  { %1619 = vmatprep.subr.bf16.mxu1 %v1767_v61 }
  0x3f   :  { %1489 = vmatmul.mubr.msk.bf16.gmra.mxu0 %vm154_vm0, %v81_v50  ;;  %1495 = vmatmul.mubr.msk.bf16.gmra.mxu1 %vm154_vm0, %v79_v40 }
  0x40   :  { %364 = vmatprep.mubr.bf16.mxu1 %v1804_v0 }
  0x41   :  { %1620 = vmatpush3.bf16.msra.mxu1 %v1768_v62 }
  0x42   :  { %1621 = vmatprep.subr.bf16.mxu1 %v1769_v63 }
  0x47   :  { %1496 = vmatmul.mubr.msk.bf16.gmra.mxu1 %vm154_vm0, %v80_v47 }
  0x48   :  { %374 = vmatprep.mubr.bf16.mxu1 %v1804_v0 }
  0x4f   :  { %1497 = vmatmul.mubr.msk.bf16.gmra.mxu1 %vm154_vm0, %v81_v50 }
  0x50   :  { %384 = vmatprep.mubr.bf16.mxu1 %v1804_v0 }
  0x57   :  { %1498 = vmatmul.mubr.msk.bf16.gmra.mxu1 %vm154_vm0, %v1902_v11 }
  0x58   :  { %394 = vmatprep.mubr.bf16.mxu1 %v1804_v0  ;;  %v1770_v0 = vld [vmem:[#allocation6 + $0x80] sm:$0xff]  }
  0x59   :  { %1622 = vmatpush3.bf16.msra.mxu1 %v1770_v0 }
  0x5f   :  { %1499 = vmatmul.mubr.msk.bf16.gmra.mxu1 %vm154_vm0, %v1930_v21 }
  0xd7   :  { %v213_v7 = vpop.f32.mrf.mxu0  ;;  %v273_v8 = vpop.f32.mrf.mxu1 }
  0xd8   :  { %v214_v9 = vadd.f32 %v213_v7, %v1988_v6  ;;  %v2019_v47 = vadd.f32 %v273_v8, %v1988_v6 }
  0xd9   :  { %v215_v11 = vpop.f32.mrf.mxu0  ;;  %v275_v12 = vpop.f32.mrf.mxu1 }
  0xda   :  { %v216_v14 = vadd.f32 %v215_v11, %v1991_v10  ;;  %v471_v17 = vmul.f32 %v1996_v13, %v214_v9  ;;  %vm406_vm1 = vcmp.ge.f32.partialorder %v214_v9, 0.0  ;;  %v2023_v49 = vadd.f32 %v275_v12, %v1991_v10 }
  0xdb   :  { %v217_v15 = vpop.f32.mrf.mxu0  ;;  %v277_v16 = vpop.f32.mrf.mxu1  ;;  %v2039_v62 = vmul.f32 %v1996_v13, %v2019_v47 }
  0xdc   :  { %v218_v18 = vadd.f32 %v217_v15, %v1988_v6  ;;  %v472_v19 = vmul.f32 %v1996_v13, %v216_v14  ;;  %vm407_vm2 = vcmp.ge.f32.partialorder %v216_v14, 0.0  ;;  %v535_v26 = vsel %vm406_vm1, %v214_v9, %v471_v17 }
  0xdd   :  { %v219_v20 = vpop.f32.mrf.mxu0  ;;  %v279_v21 = vpop.f32.mrf.mxu1  ;;  %v2027_v53 = vadd.f32 %v277_v16, %v1988_v6  ;;  %v2044_v0 = vmul.f32 %v1996_v13, %v2023_v49 }
  0xde   :  { %vm410_vm3 = vcmp.ge.f32.partialorder %v218_v18, 0.0  ;;  %v475_v22 = vmul.f32 %v1996_v13, %v218_v18  ;;  %v220_v23 = vadd.f32 %v219_v20, %v1991_v10  ;;  %v536_v32 = vsel %vm407_vm2, %v216_v14, %v472_v19 }
  0xdf   :  { %v223_v24 = vpop.f32.mrf.mxu0  ;;  %v2004_v25 = vpop.f32.mrf.mxu1  ;;  %v2033_v57 = vadd.f32 %v279_v21, %v1991_v10  ;;  %v2052_v12 = vmul.f32 %v1996_v13, %v2027_v53 }
  0xe0   :  { %v539_v27 = vsel %vm410_vm3, %v218_v18, %v475_v22  ;;  %v224_v28 = vadd.f32 %v223_v24, %v1988_v6  ;;  %vm411_vm4 = vcmp.ge.f32.partialorder %v220_v23, 0.0  ;;  %v476_v29 = vmul.f32 %v1996_v13, %v220_v23 }
  0xe1   :  { %v225_v30 = vpop.f32.mrf.mxu0  ;;  %v2008_v31 = vpop.f32.mrf.mxu1  ;;  %v599_v34 = vpack.c.bf16 %v539_v27, %v535_v26  ;;  %v2056_v14 = vmul.f32 %v1996_v13, %v2033_v57 }
  0xe2   :  { %v226_v35 = vadd.f32 %v225_v30, %v1991_v10  ;;  %v540_v38 = vsel %vm411_vm4, %v220_v23, %v476_v29  ;;  %v479_v39 = vmul.f32 %v1996_v13, %v224_v28  ;;  %vm414_vm5 = vcmp.ge.f32.partialorder %v224_v28, 0.0 }
  0xe3   :  { %v227_v36 = vpop.f32.mrf.mxu0  ;;  %v2011_v37 = vpop.f32.mrf.mxu1  ;;  %v600_v41 = vpack.c.bf16 %v540_v38, %v536_v32 }
  0xe4   :  { %v228_v40 = vadd.f32 %v227_v36, %v1988_v6  ;;  %v480_v43 = vmul.f32 %v1996_v13, %v226_v35  ;;  %vm415_vm6 = vcmp.ge.f32.partialorder %v226_v35, 0.0  ;;  %v543_v55 = vsel %vm414_vm5, %v224_v28, %v479_v39 }
  0xe5   :  { %v229_v44 = vpop.f32.mrf.mxu0  ;;  %v289_v45 = vpop.f32.mrf.mxu1  ;;  %926 = vmatprep.mubr.bf16.mxu0 %v600_v41 }
  0xe6   :  { %vm418_vm7 = vcmp.ge.f32.partialorder %v228_v40, 0.0  ;;  %v483_v48 = vmul.f32 %v1996_v13, %v228_v40  ;;  %v230_v50 = vadd.f32 %v229_v44, %v1991_v10  ;;  %927 = vmatmul.mubr.bf16.vlgmr.msra.gmra.mxu0 %v599_v34  ;;  %v544_v61 = vsel %vm415_vm6, %v226_v35, %v480_v43 }
  0xe7   :  { %v233_v51 = vpop.f32.mrf.mxu0  ;;  %v326_v52 = vpop.f32.mrf.mxu1  ;;  %v2059_v15 = vadd.f32 %v289_v45, %v1991_v10 }
  0xe8   :  { %v547_v56 = vsel %vm418_vm7, %v228_v40, %v483_v48  ;;  %vm419_vm8 = vcmp.ge.f32.partialorder %v230_v50, 0.0  ;;  %v484_v58 = vmul.f32 %v1996_v13, %v230_v50  ;;  %v327_v63 = vadd.f32 %v326_v52, %v2016_v46 }
  0xe9   :  { %v235_v59 = vpop.f32.mrf.mxu0  ;;  %v328_v60 = vpop.f32.mrf.mxu1  ;;  %v603_v5 = vpack.c.bf16 %v547_v56, %v543_v55  ;;  %v234_v7 = vadd.f32 %v233_v51, %v1988_v6 }
  0xea   :  { %v236_v1 = vadd.f32 %v235_v59, %v1991_v10  ;;  %v548_v4 = vsel %vm419_vm8, %v230_v50, %v484_v58  ;;  %v329_v8 = vadd.f32 %v328_v60, %v2029_v54  ;;  %vm408_vm9 = vcmp.ge.f32.partialorder %v327_v63, 0.0 }
  0xeb   :  { %v237_v2 = vpop.f32.mrf.mxu0  ;;  %v330_v3 = vpop.f32.mrf.mxu1  ;;  %v604_v11 = vpack.c.bf16 %v548_v4, %v544_v61  ;;  %v473_v19 = vmul.f32 %v1996_v13, %v327_v63  ;;  %vm422_vm12 = vcmp.ge.f32.partialorder %v234_v7, 0.0  ;;  %v487_v27 = vmul.f32 %v1996_v13, %v234_v7 }
  0xec   :  { %v331_v9 = vadd.f32 %v330_v3, %v2016_v46  ;;  %v488_v16 = vmul.f32 %v1996_v13, %v236_v1  ;;  %vm423_vm10 = vcmp.ge.f32.partialorder %v236_v1, 0.0  ;;  %v238_v21 = vadd.f32 %v237_v2, %v1988_v6 }
  0xed   :  { %v239_v17 = vpop.f32.mrf.mxu0  ;;  %v332_v18 = vpop.f32.mrf.mxu1  ;;  %934 = vmatprep.mubr.bf16.mxu0 %v604_v11  ;;  %vm409_vm13 = vcmp.ge.f32.partialorder %v329_v8, 0.0  ;;  %v474_v28 = vmul.f32 %v1996_v13, %v329_v8  ;;  %v537_v34 = vsel %vm408_vm9, %v327_v63, %v473_v19  ;;  %v551_v58 = vsel %vm422_vm12, %v234_v7, %v487_v27 }
  0xee   :  { %v477_v20 = vmul.f32 %v1996_v13, %v331_v9  ;;  %vm412_vm11 = vcmp.ge.f32.partialorder %v331_v9, 0.0  ;;  %v240_v22 = vadd.f32 %v239_v17, %v1991_v10  ;;  %v333_v23 = vadd.f32 %v332_v18, %v2029_v54  ;;  %935 = vmatmul.mubr.bf16.gmra.mxu0 %v603_v5 }
  0xef   :  { %v243_v24 = vpop.f32.mrf.mxu0  ;;  %v336_v26 = vpop.f32.mrf.mxu1  ;;  %v552_v33 = vsel %vm423_vm10, %v236_v1, %v488_v16  ;;  %vm426_vm0 = vcmp.ge.f32.partialorder %v238_v21, 0.0  ;;  %v491_v39 = vmul.f32 %v1996_v13, %v238_v21  ;;  %v538_v48 = vsel %vm409_vm13, %v329_v8, %v474_v28 }
  0xf0   :  { %vm427_vm14 = vcmp.ge.f32.partialorder %v240_v22, 0.0  ;;  %v492_v29 = vmul.f32 %v1996_v13, %v240_v22  ;;  %vm413_vm15 = vcmp.ge.f32.partialorder %v333_v23, 0.0  ;;  %v541_v35 = vsel %vm412_vm11, %v331_v9, %v477_v20 }
  0xf1   :  { %v245_v30 = vpop.f32.mrf.mxu0  ;;  %v338_v32 = vpop.f32.mrf.mxu1  ;;  %v478_v36 = vmul.f32 %v1996_v13, %v333_v23  ;;  %v2075_v38 = vadd.f32 %v243_v24, %v1988_v6  ;;  %v2080_v44 = vadd.f32 %v336_v26, %v2016_v46  ;;  %v601_v51 = vpack.c.bf16 %v541_v35, %v537_v34 }
  0xf2   :  { %v246_v40 = vadd.f32 %v245_v30, %v1991_v10  ;;  %v556_v43 = vsel %vm427_vm14, %v240_v22, %v492_v29  ;;  %v339_v60 = vadd.f32 %v338_v32, %v2029_v54  ;;  %v555_v3 = vsel %vm426_vm0, %v238_v21, %v491_v39 }
  0xf3   :  { %v247_v41 = vpop.f32.mrf.mxu0  ;;  %v340_v42 = vpop.f32.mrf.mxu1  ;;  %v608_v45 = vpack.c.bf16 %v556_v43, %v552_v33  ;;  %v542_v50 = vsel %vm413_vm15, %v333_v23, %v478_v36  ;;  %vm430_vm2 = vcmp.ge.f32.partialorder %v2075_v38, 0.0  ;;  %v495_v59 = vmul.f32 %v1996_v13, %v2075_v38 }
  0xf4   :  { %vm431_vm1 = vcmp.ge.f32.partialorder %v246_v40, 0.0  ;;  %v496_v52 = vmul.f32 %v1996_v13, %v246_v40  ;;  %v248_v61 = vadd.f32 %v247_v41, %v1988_v6  ;;  %v602_v2 = vpack.c.bf16 %v542_v50, %v538_v48 }
  0xf5   :  { %v249_v55 = vpop.f32.mrf.mxu0  ;;  %v342_v56 = vpop.f32.mrf.mxu1  ;;  %942 = vmatprep.mubr.bf16.mxu0 %v608_v45  ;;  %v341_v7 = vadd.f32 %v340_v42, %v2016_v46  ;;  %v607_v8 = vpack.c.bf16 %v555_v3, %v551_v58  ;;  %vm416_vm5 = vcmp.ge.f32.partialorder %v2080_v44, 0.0  ;;  %v481_v20 = vmul.f32 %v1996_v13, %v2080_v44 }
  0xf6   :  { %v250_v63 = vadd.f32 %v249_v55, %v1991_v10  ;;  %v343_v1 = vadd.f32 %v342_v56, %v2029_v54  ;;  %v560_v11 = vsel %vm431_vm1, %v246_v40, %v496_v52  ;;  %1023 = vmatprep.mubr.bf16.mxu1 %v602_v2  ;;  %v482_v21 = vmul.f32 %v1996_v13, %v339_v60 }
  0xf7   :  { %v253_v4 = vpop.f32.mrf.mxu0  ;;  %v346_v5 = vpop.f32.mrf.mxu1  ;;  %943 = vmatmul.mubr.bf16.gmra.mxu0 %v607_v8  ;;  %1024 = vmatmul.mubr.bf16.vlgmr.msra.gmra.mxu1 %v601_v51  ;;  %vm417_vm6 = vcmp.ge.f32.partialorder %v339_v60, 0.0  ;;  %vm434_vm7 = vcmp.ge.f32.partialorder %v248_v61, 0.0  ;;  %v499_v28 = vmul.f32 %v1996_v13, %v248_v61  ;;  %v485_v29 = vmul.f32 %v1996_v13, %v341_v7 }
  0xf8   :  { %v2096_v9 = vadd.f32 %v253_v4, %v1988_v6  ;;  %vm435_vm3 = vcmp.ge.f32.partialorder %v250_v63, 0.0  ;;  %v500_v16 = vmul.f32 %v1996_v13, %v250_v63  ;;  %vm421_vm4 = vcmp.ge.f32.partialorder %v343_v1, 0.0 }
  0xf9   :  { %v486_v17 = vmul.f32 %v1996_v13, %v343_v1  ;;  %v255_v18 = vpop.f32.mrf.mxu0  ;;  %v348_v19 = vpop.f32.mrf.mxu1  ;;  %v2106_v22 = vadd.f32 %v346_v5, %v2016_v46  ;;  %vm420_vm8 = vcmp.ge.f32.partialorder %v341_v7, 0.0  ;;  %v546_v42 = vsel %vm417_vm6, %v339_v60, %v482_v21 }
  0xfa   :  { %v256_v23 = vadd.f32 %v255_v18, %v1991_v10  ;;  %v564_v27 = vsel %vm435_vm3, %v250_v63, %v500_v16  ;;  %vm438_vm9 = vcmp.ge.f32.partialorder %v2096_v9, 0.0  ;;  %v2116_v33 = vmul.f32 %v1996_v13, %v2096_v9 }
  0xfb   :  { %v257_v24 = vpop.f32.mrf.mxu0  ;;  %v350_v26 = vpop.f32.mrf.mxu1  ;;  %v612_v30 = vpack.c.bf16 %v564_v27, %v560_v11  ;;  %v550_v32 = vsel %vm421_vm4, %v343_v1, %v486_v17  ;;  %v2119_v34 = vadd.f32 %v348_v19, %v2029_v54  ;;  %v2123_v39 = vmul.f32 %v1996_v13, %v2106_v22 }
  0xfc   :  { %v2126_v40 = vadd.f32 %v257_v24, %v1988_v6  ;;  %v2129_v41 = vadd.f32 %v350_v26, %v2016_v46  ;;  %vm424_vm10 = vcmp.ge.f32.partialorder %v2106_v22, 0.0  ;;  %vm439_vm11 = vcmp.ge.f32.partialorder %v256_v23, 0.0 }
  0xfd   :  { %v259_v35 = vpop.f32.mrf.mxu0  ;;  %v352_v36 = vpop.f32.mrf.mxu1  ;;  %950 = vmatprep.mubr.bf16.mxu0 %v612_v30  ;;  %v606_v45 = vpack.c.bf16 %v550_v32, %v546_v42  ;;  %v559_v48 = vsel %vm430_vm2, %v2075_v38, %v495_v59  ;;  %v504_v52 = vmul.f32 %v1996_v13, %v256_v23  ;;  %v563_v56 = vsel %vm434_vm7, %v248_v61, %v499_v28 }
  0xfe   :  { %v260_v43 = vadd.f32 %v259_v35, %v1991_v10  ;;  %v353_v55 = vadd.f32 %v352_v36, %v2029_v54  ;;  %v549_v58 = vsel %vm420_vm8, %v341_v7, %v485_v29  ;;  %vm425_vm12 = vcmp.ge.f32.partialorder %v2119_v34, 0.0 }
  0xff   :  { %v263_v50 = vpop.f32.mrf.mxu0  ;;  %v356_v51 = vpop.f32.mrf.mxu1  ;;  %1031 = vmatprep.mubr.bf16.mxu1 %v606_v45  ;;  %v545_v63 = vsel %vm416_vm5, %v2080_v44, %v481_v20  ;;  %v490_v2 = vmul.f32 %v1996_v13, %v2119_v34  ;;  %v611_v61 = vpack.c.bf16 %v563_v56, %v559_v48  ;;  %vm442_vm14 = vcmp.ge.f32.partialorder %v2126_v40, 0.0 }
 0x100   :  { %v508_v60 = vmul.f32 %v1996_v13, %v260_v43  ;;  %v2147_v38 = vadd.f32 %v263_v50, %v1988_v6  ;;  %vm443_vm13 = vcmp.ge.f32.partialorder %v260_v43, 0.0  ;;  %v605_v3 = vpack.c.bf16 %v549_v58, %v545_v63 }
 0x101   :  { %v265_v59 = vpop.f32.mrf.mxu0  ;;  %v358_v1 = vpop.f32.mrf.mxu1  ;;  %v507_v4 = vmul.f32 %v1996_v13, %v2126_v40  ;;  %vm428_vm15 = vcmp.ge.f32.partialorder %v2129_v41, 0.0  ;;  %v493_v11 = vmul.f32 %v1996_v13, %v2129_v41  ;;  %vm429_vm0 = vcmp.ge.f32.partialorder %v353_v55, 0.0  ;;  %951 = vmatmul.mubr.bf16.gmra.mxu0 %v611_v61 }
 0x102   :  { %v266_v5 = vadd.f32 %v265_v59, %v1991_v10  ;;  %v2156_v44 = vadd.f32 %v358_v1, %v2029_v54  ;;  %v494_v16 = vmul.f32 %v1996_v13, %v353_v55  ;;  %1032 = vmatmul.mubr.bf16.gmra.mxu1 %v605_v3  ;;  %vm446_vm1 = vcmp.ge.f32.partialorder %v2147_v38, 0.0 }
 0x103   :  { %v267_v7 = vpop.f32.mrf.mxu0  ;;  %v360_v8 = vpop.f32.mrf.mxu1  ;;  %v568_v20 = vsel %vm439_vm11, %v256_v23, %v504_v52  ;;  %v572_v21 = vsel %vm443_vm13, %v260_v43, %v508_v60  ;;  %vm459_vm2 = vcmp.ge.f32.partialorder %v2033_v57, 0.0  ;;  %v511_v24 = vmul.f32 %v1996_v13, %v2147_v38 }
 0x104   :  { %v268_v17 = vadd.f32 %v267_v7, %v1988_v6  ;;  %v2170_v26 = vadd.f32 %v356_v51, %v2016_v46  ;;  %vm447_vm3 = vcmp.ge.f32.partialorder %v266_v5, 0.0  ;;  %v361_v27 = vadd.f32 %v360_v8, %v2016_v46 }
 0x105   :  { %v269_v18 = vpop.f32.mrf.mxu0  ;;  %v362_v19 = vpop.f32.mrf.mxu1  ;;  %v512_v28 = vmul.f32 %v1996_v13, %v266_v5  ;;  %vm433_vm4 = vcmp.ge.f32.partialorder %v2156_v44, 0.0  ;;  %vm455_vm5 = vcmp.ge.f32.partialorder %v2023_v49, 0.0  ;;  %v498_v32 = vmul.f32 %v1996_v13, %v2156_v44 }
 0x106   :  { %v270_v29 = vadd.f32 %v269_v18, %v1991_v10  ;;  %v363_v23 = vadd.f32 %v362_v19, %v2029_v54  ;;  %v616_v35 = vpack.c.bf16 %v572_v21, %v568_v20  ;;  %v558_v36 = vsel %vm429_vm0, %v353_v55, %v494_v16 }
 0x107   :  { %v366_v30 = vpop.f32.mrf.mxu1  ;;  %v567_v42 = vsel %vm438_vm9, %v2096_v9, %v2116_v33  ;;  %vm454_vm6 = vcmp.ge.f32.partialorder %v2019_v47, 0.0  ;;  %v515_v43 = vmul.f32 %v1996_v13, %v268_v17  ;;  %v554_v48 = vsel %vm425_vm12, %v2119_v34, %v490_v2 }
 0x108   :  { %vm451_vm7 = vcmp.ge.f32.partialorder %v270_v29, 0.0  ;;  %v516_v45 = vmul.f32 %v1996_v13, %v270_v29  ;;  %vm458_vm8 = vcmp.ge.f32.partialorder %v2027_v53, 0.0  ;;  %958 = vmatprep.mubr.bf16.mxu0 %v616_v35  ;;  %v610_v51 = vpack.c.bf16 %v558_v36, %v554_v48 }
 0x109   :  { %v368_v50 = vpop.f32.mrf.mxu1  ;;  %v571_v9 = vsel %vm442_vm14, %v2126_v40, %v507_v4  ;;  %v553_v33 = vsel %vm424_vm10, %v2106_v22, %v2123_v39  ;;  %v557_v52 = vsel %vm428_vm15, %v2129_v41, %v493_v11  ;;  %v502_v34 = vmul.f32 %v1996_v13, %v363_v23 }
 0x10a   :  { %v615_v55 = vpack.c.bf16 %v571_v9, %v567_v42  ;;  %v609_v56 = vpack.c.bf16 %v557_v52, %v553_v33  ;;  %v369_v58 = vadd.f32 %v368_v50, %v2029_v54  ;;  %vm450_vm9 = vcmp.ge.f32.partialorder %v268_v17, 0.0  ;;  %1039 = vmatprep.mubr.bf16.mxu1 %v610_v51 }
 0x10b   :  { %v370_v60 = vpop.f32.mrf.mxu1  ;;  %vm437_vm11 = vcmp.ge.f32.partialorder %v363_v23, 0.0  ;;  %v576_v40 = vsel %vm447_vm3, %v266_v5, %v512_v28  ;;  %v580_v63 = vsel %vm451_vm7, %v270_v29, %v516_v45  ;;  %vm432_vm10 = vcmp.ge.f32.partialorder %v2170_v26, 0.0 }
 0x10c   :  { %v497_v22 = vmul.f32 %v1996_v13, %v2170_v26  ;;  %vm436_vm12 = vcmp.ge.f32.partialorder %v361_v27, 0.0  ;;  %v501_v39 = vmul.f32 %v1996_v13, %v361_v27  ;;  %959 = vmatmul.mubr.bf16.gmra.mxu0 %v615_v55  ;;  %1040 = vmatmul.mubr.bf16.gmra.mxu1 %v609_v56  ;;  %v506_v59 = vmul.f32 %v1996_v13, %v369_v58 }
 0x10d   :  { %v372_v41 = vpop.f32.mrf.mxu1  ;;  %v620_v2 = vpack.c.bf16 %v580_v63, %v576_v40  ;;  %v562_v61 = vsel %vm433_vm4, %v2156_v44, %v498_v32  ;;  %vm441_vm13 = vcmp.ge.f32.partialorder %v369_v58, 0.0  ;;  %v566_v3 = vsel %vm437_vm11, %v363_v23, %v502_v34 }
 0x10e   :  { %v373_v1 = vadd.f32 %v372_v41, %v2029_v54  ;;  %v575_v4 = vsel %vm446_vm1, %v2147_v38, %v511_v24  ;;  %v579_v5 = vsel %vm450_vm9, %v268_v17, %v515_v43  ;;  %v371_v8 = vadd.f32 %v370_v60, %v2016_v46 }
 0x10f   :  { %v376_v7 = vpop.f32.mrf.mxu1  ;;  %966 = vmatprep.mubr.bf16.mxu0 %v620_v2  ;;  %v614_v16 = vpack.c.bf16 %v566_v3, %v562_v61  ;;  %v367_v18 = vadd.f32 %v366_v30, %v2016_v46  ;;  %v619_v44 = vpack.c.bf16 %v579_v5, %v575_v4  ;;  %v565_v19 = vsel %vm436_vm12, %v361_v27, %v501_v39 }
 0x110   :  { %vm445_vm14 = vcmp.ge.f32.partialorder %v373_v1, 0.0  ;;  %v510_v11 = vmul.f32 %v1996_v13, %v373_v1  ;;  %v588_v38 = vsel %vm459_vm2, %v2033_v57, %v2056_v14  ;;  %v561_v17 = vsel %vm432_vm10, %v2170_v26, %v497_v22 }
 0x111   :  { %v378_v20 = vpop.f32.mrf.mxu1  ;;  %1047 = vmatprep.mubr.bf16.mxu1 %v614_v16  ;;  %v570_v24 = vsel %vm441_vm13, %v369_v58, %v506_v59  ;;  %v286_v29 = vadd.f32 %v2008_v31, %v1991_v10  ;;  %v613_v27 = vpack.c.bf16 %v565_v19, %v561_v17  ;;  %v584_v57 = vsel %vm455_vm5, %v2023_v49, %v2044_v0 }
 0x112   :  { %v379_v21 = vadd.f32 %v378_v20, %v2029_v54  ;;  %v574_v28 = vsel %vm445_vm14, %v373_v1, %v510_v11  ;;  %v509_v30 = vmul.f32 %v1996_v13, %v371_v8  ;;  %v624_v32 = vpack.c.bf16 %v588_v38, %v584_v57 }
 0x113   :  { %v380_v14 = vpop.f32.mrf.mxu1  ;;  %v618_v23 = vpack.c.bf16 %v574_v28, %v570_v24  ;;  %v583_v26 = vsel %vm454_vm6, %v2019_v47, %v2039_v62  ;;  %v288_v35 = vadd.f32 %v2011_v37, %v1988_v6  ;;  %v532_v10 = vmul.f32 %v1996_v13, %v2059_v15 }
 0x114   :  { %vm444_vm15 = vcmp.ge.f32.partialorder %v371_v8, 0.0  ;;  %967 = vmatmul.mubr.bf16.gmra.mxu0 %v619_v44  ;;  %1048 = vmatmul.mubr.bf16.gmra.mxu1 %v613_v27  ;;  %v587_v49 = vsel %vm458_vm8, %v2027_v53, %v2052_v12  ;;  %vm467_vm0 = vcmp.ge.f32.partialorder %v2059_v15, 0.0  ;;  %v505_v0 = vmul.f32 %v1996_v13, %v367_v18  ;;  %v1771_v27 = vld [vmem:[%s2508_s7 + $0x38] sm:$0xff]  }
 0x115   :  { %v382_v31 = vpop.f32.mrf.mxu1  ;;  %974 = vmatprep.mubr.bf16.mxu0 %v624_v32  ;;  %v514_v47 = vmul.f32 %v1996_v13, %v379_v21  ;;  %1055 = vmatprep.mubr.bf16.mxu1 %v618_v23  ;;  %vm463_vm1 = vcmp.ge.f32.partialorder %v286_v29, 0.0  ;;  %v528_v62 = vmul.f32 %v1996_v13, %v286_v29  ;;  %vm440_vm2 = vcmp.ge.f32.partialorder %v367_v18, 0.0 }
 0x116   :  { %v383_v37 = vadd.f32 %v382_v31, %v2029_v54  ;;  %vm449_vm3 = vcmp.ge.f32.partialorder %v379_v21, 0.0  ;;  %v381_v42 = vadd.f32 %v380_v14, %v2016_v46  ;;  %v573_v12 = vsel %vm444_vm15, %v371_v8, %v509_v30  ;;  %1687 = vmatprep.subr.bf16.mxu0 %v1771_v27 }
 0x117   :  { %v386_v36 = vpop.f32.mrf.mxu1  ;;  %v284_v43 = vadd.f32 %v2004_v25, %v1988_v6  ;;  %v531_v45 = vmul.f32 %v1996_v13, %v288_v35  ;;  %v377_v48 = vadd.f32 %v376_v7, %v2016_v46  ;;  %v596_v50 = vsel %vm467_vm0, %v2059_v15, %v532_v10  ;;  %1688 = vmatpush3.bf16.msra.mxu0 %v1771_v27 }
 0x118   :  { %vm453_vm4 = vcmp.ge.f32.partialorder %v383_v37, 0.0  ;;  %v518_v53 = vmul.f32 %v1996_v13, %v383_v37  ;;  %v569_v9 = vsel %vm440_vm2, %v367_v18, %v505_v0  ;;  %v578_v52 = vsel %vm449_vm3, %v379_v21, %v514_v47  ;;  %v1772_v47 = vld [vmem:[%s2508_s7 + $0x30] sm:$0xff]  }
 0x119   :  { %v388_v51 = vpop.f32.mrf.mxu1  ;;  %v623_v55 = vpack.c.bf16 %v587_v49, %v583_v26  ;;  %v617_v56 = vpack.c.bf16 %v573_v12, %v569_v9  ;;  %v592_v58 = vsel %vm463_vm1, %v286_v29, %v528_v62  ;;  %vm466_vm5 = vcmp.ge.f32.partialorder %v288_v35, 0.0  ;;  %1689 = vmatprep.subr.bf16.mxu0 %v1772_v47  ;;  %v1773_v62 = vld [vmem:[%s2508_s7 + $0x28] sm:$0xff]   ;;  %v1778_v12 = vld [vmem:[%s2508_s7] sm:$0xff]  }
 0x11a   :  { %v389_v33 = vadd.f32 %v388_v51, %v2029_v54  ;;  %v582_v34 = vsel %vm453_vm4, %v383_v37, %v518_v53  ;;  %v517_v25 = vmul.f32 %v1996_v13, %v381_v42  ;;  %v628_v40 = vpack.c.bf16 %v596_v50, %v592_v58  ;;  %v1777_v53 = vld [vmem:[%s2508_s7 + $0x8] sm:$0xff]  }
 0x11b   :  { %v390_v60 = vpop.f32.mrf.mxu1  ;;  %v622_v6 = vpack.c.bf16 %v582_v34, %v578_v52  ;;  %v527_v63 = vmul.f32 %v1996_v13, %v284_v43  ;;  %v513_v15 = vmul.f32 %v1996_v13, %v377_v48  ;;  %vm452_vm6 = vcmp.ge.f32.partialorder %v381_v42, 0.0  ;;  %1690 = vmatpush3.bf16.msra.mxu0 %v1772_v47 }
 0x11c   :  { %975 = vmatmul.mubr.bf16.gmra.mxu0 %v623_v55  ;;  %1056 = vmatmul.mubr.bf16.gmra.mxu1 %v617_v56  ;;  %vm462_vm7 = vcmp.ge.f32.partialorder %v284_v43, 0.0  ;;  %vm448_vm8 = vcmp.ge.f32.partialorder %v377_v48, 0.0  ;;  %v522_v39 = vmul.f32 %v1996_v13, %v389_v33  ;;  %vm457_vm9 = vcmp.ge.f32.partialorder %v389_v33, 0.0  ;;  %v2316_v55 = vld [vmem:[%s2506_s5] ss:$0 sm:$0xff] }
 0x11d   :  { %v392_v22 = vpop.f32.mrf.mxu1  ;;  %982 = vmatprep.mubr.bf16.mxu0 %v628_v40  ;;  %1063 = vmatprep.mubr.bf16.mxu1 %v622_v6  ;;  %v595_v59 = vsel %vm466_vm5, %v288_v35, %v531_v45  ;;  %v391_v2 = vadd.f32 %v390_v60, %v2016_v46  ;;  %v581_v3 = vsel %vm452_vm6, %v381_v42, %v517_v25  ;;  %v1776_v42 = vld [vmem:[%s2508_s7 + $0x10] sm:$0xff]  }
 0x11e   :  { %v393_v41 = vadd.f32 %v392_v22, %v2029_v54  ;;  %v591_v4 = vsel %vm462_vm7, %v284_v43, %v527_v63  ;;  %v577_v5 = vsel %vm448_vm8, %v377_v48, %v513_v15  ;;  %v387_v8 = vadd.f32 %v386_v36, %v2016_v46  ;;  %1691 = vmatprep.subr.bf16.mxu0 %v1773_v62  ;;  %v1775_v36 = vld [vmem:[%s2508_s7 + $0x18] sm:$0xff]  }
 0x11f   :  { %v396_v1 = vpop.f32.mrf.mxu1  ;;  %v586_v16 = vsel %vm457_vm9, %v389_v33, %v522_v39  ;;  %v627_v44 = vpack.c.bf16 %v595_v59, %v591_v4  ;;  %v621_v19 = vpack.c.bf16 %v581_v3, %v577_v5  ;;  %v525_v17 = vmul.f32 %v1996_v13, %v391_v2  ;;  %1692 = vmatpush3.bf16.msra.mxu0 %v1773_v62 }
 0x120   :  { %vm461_vm11 = vcmp.ge.f32.partialorder %v393_v41, 0.0  ;;  %v526_v61 = vmul.f32 %v1996_v13, %v393_v41  ;;  %vm460_vm10 = vcmp.ge.f32.partialorder %v391_v2, 0.0  ;;  %v521_v24 = vmul.f32 %v1996_v13, %v387_v8 }
 0x121   :  { %v398_v7 = vpop.f32.mrf.mxu1  ;;  %vm456_vm12 = vcmp.ge.f32.partialorder %v387_v8, 0.0  ;;  %v589_v23 = vsel %vm460_vm10, %v391_v2, %v525_v17  ;;  %v397_v30 = vadd.f32 %v396_v1, %v2016_v46 }
 0x122   :  { %v399_v11 = vadd.f32 %v398_v7, %v2029_v54  ;;  %v590_v18 = vsel %vm461_vm11, %v393_v41, %v526_v61  ;;  %v585_v32 = vsel %vm456_vm12, %v387_v8, %v521_v24  ;;  %v2322_v41 = vstv %s2507_s6 }
 0x123   :  { %v400_v38 = vpop.f32.mrf.mxu1  ;;  %v626_v20 = vpack.c.bf16 %v590_v18, %v586_v16  ;;  %v529_v49 = vmul.f32 %v1996_v13, %v397_v30  ;;  %vm464_vm0 = vcmp.ge.f32.partialorder %v397_v30, 0.0 }
 0x124   :  { %983 = vmatmul.mubr.bf16.gmra.mxu0 %v627_v44  ;;  %1064 = vmatmul.mubr.bf16.gmra.mxu1 %v621_v19  ;;  %v530_v28 = vmul.f32 %v1996_v13, %v399_v11  ;;  %vm465_vm13 = vcmp.ge.f32.partialorder %v399_v11, 0.0  ;;  %v401_v57 = vadd.f32 %v400_v38, %v2016_v46 }
 0x125   :  { %v402_v21 = vpop.f32.mrf.mxu1  ;;  %1071 = vmatprep.mubr.bf16.mxu1 %v626_v20  ;;  %v593_v46 = vsel %vm464_vm0, %v397_v30, %v529_v49 }
 0x126   :  { %v403_v29 = vadd.f32 %v402_v21, %v2029_v54  ;;  %v594_v26 = vsel %vm465_vm13, %v399_v11, %v530_v28  ;;  %v625_v54 = vpack.c.bf16 %v589_v23, %v585_v32  ;;  %v533_v31 = vmul.f32 %v1996_v13, %v401_v57 }
 0x127   :  { %vm468_vm15 = vcmp.ge.f32.partialorder %v401_v57, 0.0 }
 0x128   :  { %vm469_vm14 = vcmp.ge.f32.partialorder %v403_v29, 0.0  ;;  %v534_v14 = vmul.f32 %v1996_v13, %v403_v29  ;;  %v597_v0 = vsel %vm468_vm15, %v401_v57, %v533_v31  ;;  %v1774_v13 = vld [vmem:[%s2508_s7 + $0x20] sm:$0xff]  }
 0x129   :  { %v629_v37 = vpack.c.bf16 %v597_v0, %v593_v46  ;;  %1693 = vmatprep.subr.bf16.mxu0 %v1774_v13 }
 0x12a   :  { %v598_v35 = vsel %vm469_vm14, %v403_v29, %v534_v14  ;;  %1694 = vmatpush3.bf16.msra.mxu0 %v1774_v13 }
 0x12b   :  { %v630_v10 = vpack.c.bf16 %v598_v35, %v594_v26  ;;  %1695 = vmatprep.subr.bf16.mxu0 %v1775_v36 }
 0x12c   :  { %1072 = vmatmul.mubr.bf16.gmra.mxu1 %v625_v54 }
 0x12d   :  { %1079 = vmatprep.mubr.bf16.mxu1 %v630_v10 }
 0x12e   :  { %1696 = vmatpush3.bf16.msra.mxu0 %v1775_v36 }
 0x12f   :  { %1697 = vmatprep.subr.bf16.mxu0 %v1776_v42 }
 0x132   :  { %1698 = vmatpush3.bf16.msra.mxu0 %v1776_v42 }
 0x133   :  { %1699 = vmatprep.subr.bf16.mxu0 %v1777_v53 }
 0x134   :  { %1080 = vmatmul.mubr.bf16.gmra.mxu1 %v629_v37 }
 0x136   :  { %1700 = vmatpush3.bf16.msra.mxu0 %v1777_v53 }
 0x137   :  { %1701 = vmatprep.subr.bf16.mxu0 %v1778_v12 }
 0x13a   :  { %1702 = vmatpush3.bf16.msra.mxu0 %v1778_v12 }
 0x1a6   :  { %v1559_v43 = vpop.f32.mrf.mxu0 }
 0x1a8   :  { %v1560_v45 = vpop.f32.mrf.mxu0 }
 0x1a9   :  { %v1561_v34 = vadd.f32 %v1560_v45, %v1559_v43 }
 0x1aa   :  { %v1562_v48 = vpop.f32.mrf.mxu0 }
 0x1ab   :  { %v929_v25 = vadd.f32 %v1561_v34, %v2316_v55 }
 0x1ac   :  { %v1563_v50 = vpop.f32.mrf.mxu0 }
 0x1ad   :  { %v1564_v40 = vadd.f32 %v1563_v50, %v1562_v48 }
 0x1ae   :  { %v1565_v51 = vpop.f32.mrf.mxu0 }
 0x1af   :  { %v932_v2 = vadd.f32 %v1564_v40, %v2316_v55 }
 0x1b0   :  { %v1566_v9 = vpop.f32.mrf.mxu0 }
 0x1b1   :  { %v1567_v3 = vadd.f32 %v1566_v9, %v1565_v51 }
 0x1b2   :  { %v1568_v33 = vpop.f32.mrf.mxu0 }
 0x1b3   :  { %v937_v16 = vadd.f32 %v1567_v3, %v2316_v55 }
 0x1b4   :  { %v1569_v52 = vpop.f32.mrf.mxu0 }
 0x1b5   :  { %v1570_v19 = vadd.f32 %v1569_v52, %v1568_v33 }
 0x1b7   :  { %v1571_v56 = vpop.f32.mrf.mxu0  ;;  %v1623_v58 = vpop.f32.mrf.mxu1  ;;  %v940_v14 = vadd.f32 %v1570_v19, %v2316_v55 }
 0x1b9   :  { %v1572_v60 = vpop.f32.mrf.mxu0  ;;  %v1624_v6 = vpop.f32.mrf.mxu1 }
 0x1ba   :  { %v1625_v63 = vadd.f32 %v1624_v6, %v1623_v58  ;;  %v1573_v30 = vadd.f32 %v1572_v60, %v1571_v56 }
 0x1bb   :  { %v1574_v15 = vpop.f32.mrf.mxu0  ;;  %v1626_v22 = vpop.f32.mrf.mxu1 }
 0x1bc   :  { %v1026_v39 = vadd.f32 %v1625_v63, %v929_v25  ;;  %v945_v0 = vadd.f32 %v1573_v30, %v2316_v55 }
 0x1bd   :  { %v1575_v59 = vpop.f32.mrf.mxu0  ;;  %v1627_v1 = vpop.f32.mrf.mxu1 }
 0x1be   :  { %v1628_v61 = vadd.f32 %v1627_v1, %v1626_v22  ;;  %v1106_v4 = vmul.f32 %v2322_v41, %v1026_v39  ;;  %vm1089_vm1 = vcmp.ge.f32.partialorder %v1026_v39, 0.0  ;;  %v1576_v47 = vadd.f32 %v1575_v59, %v1574_v15 }
 0x1c0   :  { %v1029_v5 = vadd.f32 %v1628_v61, %v932_v2  ;;  %v1122_v20 = vsel %vm1089_vm1, %v1026_v39, %v1106_v4  ;;  %v948_v48 = vadd.f32 %v1576_v47, %v2316_v55 }
 0x1c1   :  { %v1577_v7 = vpop.f32.mrf.mxu0 }
 0x1c2   :  { %v1629_v8 = vpop.f32.mrf.mxu1  ;;  %vm1090_vm2 = vcmp.ge.f32.partialorder %v1029_v5, 0.0  ;;  %v1107_v11 = vmul.f32 %v2322_v41, %v1029_v5 }
 0x1c3   :  { %v1578_v18 = vpop.f32.mrf.mxu0 }
 0x1c4   :  { %v1630_v44 = vpop.f32.mrf.mxu1  ;;  %v1123_v17 = vsel %vm1090_vm2, %v1029_v5, %v1107_v11  ;;  %v1579_v12 = vadd.f32 %v1578_v18, %v1577_v7  ;;  %vm1387_vm2 = vcmask 130048  }
 0x1c5   :  { %v1631_v38 = vadd.f32 %v1630_v44, %v1629_v8  ;;  %v1580_v21 = vpop.f32.mrf.mxu0  ;;  %v1138_v28 = vpack.c.bf16 %v1123_v17, %v1122_v20 }
 0x1c6   :  { %v1632_v24 = vpop.f32.mrf.mxu1  ;;  %v953_v34 = vadd.f32 %v1579_v12, %v2316_v55 }
 0x1c7   :  { %v1034_v29 = vadd.f32 %v1631_v38, %v937_v16  ;;  %v1581_v27 = vpop.f32.mrf.mxu0  ;;  %1703 = vmatprep.mubr.bf16.mxu0 %v1138_v28 }
 0x1c8   :  { %v1633_v57 = vpop.f32.mrf.mxu1  ;;  %v1582_v60 = vadd.f32 %v1581_v27, %v1580_v21 }
 0x1c9   :  { %v1634_v23 = vadd.f32 %v1633_v57, %v1632_v24  ;;  %v1108_v32 = vmul.f32 %v2322_v41, %v1034_v29  ;;  %vm1091_vm3 = vcmp.ge.f32.partialorder %v1034_v29, 0.0 }
 0x1ca   :  { %v956_v3 = vadd.f32 %v1582_v60, %v2316_v55 }
 0x1cb   :  { %v1037_v26 = vadd.f32 %v1634_v23, %v940_v14  ;;  %v1124_v37 = vsel %vm1091_vm3, %v1034_v29, %v1108_v32 }
 0x1cc   :  { %v1583_v35 = vpop.f32.mrf.mxu0  ;;  %v1635_v54 = vpop.f32.mrf.mxu1 }
 0x1cd   :  { %vm1092_vm4 = vcmp.ge.f32.partialorder %v1037_v26, 0.0  ;;  %v1109_v10 = vmul.f32 %v2322_v41, %v1037_v26 }
 0x1ce   :  { %v1584_v31 = vpop.f32.mrf.mxu0  ;;  %v1636_v49 = vpop.f32.mrf.mxu1 }
 0x1cf   :  { %v1637_v46 = vadd.f32 %v1636_v49, %v1635_v54  ;;  %v1125_v62 = vsel %vm1092_vm4, %v1037_v26, %v1109_v10  ;;  %v1585_v59 = vadd.f32 %v1584_v31, %v1583_v35 }
 0x1d0   :  { %v1586_v13 = vpop.f32.mrf.mxu0  ;;  %v1638_v36 = vpop.f32.mrf.mxu1  ;;  %v1139_v42 = vpack.c.bf16 %v1125_v62, %v1124_v37 }
 0x1d1   :  { %v1042_v53 = vadd.f32 %v1637_v46, %v945_v0  ;;  %v961_v16 = vadd.f32 %v1585_v59, %v2316_v55 }
 0x1d2   :  { %v1587_v43 = vpop.f32.mrf.mxu0  ;;  %v1639_v45 = vpop.f32.mrf.mxu1  ;;  %1704 = vmatmul.mubr.bf16.vlgmr.msra.gmra.mxu0 %v1139_v42 }
 0x1d3   :  { %v1640_v50 = vadd.f32 %v1639_v45, %v1638_v36  ;;  %v1110_v33 = vmul.f32 %v2322_v41, %v1042_v53  ;;  %vm1093_vm5 = vcmp.ge.f32.partialorder %v1042_v53, 0.0  ;;  %v1588_v19 = vadd.f32 %v1587_v43, %v1586_v13 }
 0x1d4   :  { %v1589_v51 = vpop.f32.mrf.mxu0  ;;  %v1641_v9 = vpop.f32.mrf.mxu1 }
 0x1d5   :  { %v1045_v52 = vadd.f32 %v1640_v50, %v948_v48  ;;  %v1126_v22 = vsel %vm1093_vm5, %v1042_v53, %v1110_v33  ;;  %v964_v23 = vadd.f32 %v1588_v19, %v2316_v55 }
 0x1d6   :  { %v1590_v56 = vpop.f32.mrf.mxu0  ;;  %v1642_v58 = vpop.f32.mrf.mxu1 }
 0x1d7   :  { %vm1094_vm6 = vcmp.ge.f32.partialorder %v1045_v52, 0.0  ;;  %v1111_v6 = vmul.f32 %v2322_v41, %v1045_v52  ;;  %v1643_v25 = vadd.f32 %v1642_v58, %v1641_v9  ;;  %v1591_v27 = vadd.f32 %v1590_v56, %v1589_v51 }
 0x1d8   :  { %v1592_v40 = vpop.f32.mrf.mxu0  ;;  %v1644_v63 = vpop.f32.mrf.mxu1 }
 0x1d9   :  { %v1050_v15 = vadd.f32 %v1643_v25, %v953_v34  ;;  %v1127_v39 = vsel %vm1094_vm6, %v1045_v52, %v1111_v6  ;;  %v969_v10 = vadd.f32 %v1591_v27, %v2316_v55 }
 0x1da   :  { %v1593_v1 = vpop.f32.mrf.mxu0  ;;  %v1645_v2 = vpop.f32.mrf.mxu1  ;;  %v1140_v61 = vpack.c.bf16 %v1127_v39, %v1126_v22 }
 0x1db   :  { %v1646_v4 = vadd.f32 %v1645_v2, %v1644_v63  ;;  %v1112_v8 = vmul.f32 %v2322_v41, %v1050_v15  ;;  %vm1095_vm7 = vcmp.ge.f32.partialorder %v1050_v15, 0.0  ;;  %v1594_v49 = vadd.f32 %v1593_v1, %v1592_v40 }
 0x1dc   :  { %v1595_v5 = vpop.f32.mrf.mxu0  ;;  %v1647_v7 = vpop.f32.mrf.mxu1  ;;  %1707 = vmatprep.mubr.bf16.mxu0 %v1140_v61 }
 0x1dd   :  { %v1053_v11 = vadd.f32 %v1646_v4, %v956_v3  ;;  %v1128_v28 = vsel %vm1095_vm7, %v1050_v15, %v1112_v8  ;;  %v972_v43 = vadd.f32 %v1594_v49, %v2316_v55 }
 0x1de   :  { %v1596_v18 = vpop.f32.mrf.mxu0  ;;  %v1648_v44 = vpop.f32.mrf.mxu1 }
 0x1df   :  { %vm1096_vm8 = vcmp.ge.f32.partialorder %v1053_v11, 0.0  ;;  %v1113_v38 = vmul.f32 %v2322_v41, %v1053_v11  ;;  %v1649_v20 = vadd.f32 %v1648_v44, %v1647_v7  ;;  %v1597_v42 = vadd.f32 %v1596_v18, %v1595_v5 }
 0x1e0   :  { %v1598_v17 = vpop.f32.mrf.mxu0  ;;  %v1650_v21 = vpop.f32.mrf.mxu1 }
 0x1e1   :  { %v1058_v24 = vadd.f32 %v1649_v20, %v961_v16  ;;  %v1129_v29 = vsel %vm1096_vm8, %v1053_v11, %v1113_v38  ;;  %v977_v33 = vadd.f32 %v1597_v42, %v2316_v55 }
 0x1e2   :  { %v1651_v57 = vpop.f32.mrf.mxu1  ;;  %v1141_v14 = vpack.c.bf16 %v1129_v29, %v1128_v28  ;;  %v1599_v32 = vpop.f32.mrf.mxu0 }
 0x1e3   :  { %v1652_v30 = vadd.f32 %v1651_v57, %v1650_v21  ;;  %v1114_v35 = vmul.f32 %v2322_v41, %v1058_v24  ;;  %vm1097_vm9 = vcmp.ge.f32.partialorder %v1058_v24, 0.0  ;;  %v1600_v34 = vadd.f32 %v1599_v32, %v1598_v17 }
 0x1e4   :  { %v1653_v26 = vpop.f32.mrf.mxu1  ;;  %1708 = vmatmul.mubr.bf16.gmra.mxu0 %v1141_v14  ;;  %v1601_v46 = vpop.f32.mrf.mxu0 }
 0x1e5   :  { %v1061_v54 = vadd.f32 %v1652_v30, %v964_v23  ;;  %v1130_v13 = vsel %vm1097_vm9, %v1058_v24, %v1114_v35  ;;  %v980_v59 = vadd.f32 %v1600_v34, %v2316_v55  ;;  %v2358_v30 = vld [vmem:[%s2509_s8] ss:$0 sm:$0xff] }
 0x1e6   :  { %v1654_v31 = vpop.f32.mrf.mxu1  ;;  %v1602_v48 = vpop.f32.mrf.mxu0 }
 0x1e7   :  { %vm1098_vm11 = vcmp.ge.f32.partialorder %v1061_v54, 0.0  ;;  %v1115_v0 = vmul.f32 %v2322_v41, %v1061_v54  ;;  %v1655_v47 = vadd.f32 %v1654_v31, %v1653_v26  ;;  %v1603_v15 = vadd.f32 %v1602_v48, %v1601_v46 }
 0x1e8   :  { %v1656_v37 = vpop.f32.mrf.mxu1  ;;  %v1604_v60 = vpop.f32.mrf.mxu0 }
 0x1e9   :  { %v1066_v62 = vadd.f32 %v1655_v47, %v969_v10  ;;  %v1131_v36 = vsel %vm1098_vm11, %v1061_v54, %v1115_v0  ;;  %v985_v5 = vadd.f32 %v1603_v15, %v2316_v55  ;;  %v2371_v10 = vld [vmem:[%s2511_s10] ss:$0 sm:$0xff] }
 0x1ea   :  { %v1657_v53 = vpop.f32.mrf.mxu1  ;;  %v1142_v12 = vpack.c.bf16 %v1131_v36, %v1130_v13  ;;  %v1605_v2 = vpop.f32.mrf.mxu0 }
 0x1eb   :  { %v1658_v45 = vadd.f32 %v1657_v53, %v1656_v37  ;;  %v1116_v51 = vmul.f32 %v2322_v41, %v1066_v62  ;;  %vm1099_vm10 = vcmp.ge.f32.partialorder %v1066_v62, 0.0  ;;  %v1606_v8 = vadd.f32 %v1605_v2, %v1604_v60 }
 0x1ec   :  { %v1659_v50 = vpop.f32.mrf.mxu1  ;;  %1711 = vmatprep.mubr.bf16.mxu0 %v1142_v12 }
 0x1ed   :  { %v1069_v9 = vadd.f32 %v1658_v45, %v972_v43  ;;  %v1132_v40 = vsel %vm1099_vm10, %v1066_v62, %v1116_v51  ;;  %v988_v21 = vadd.f32 %v1606_v8, %v2316_v55  ;;  %v2363_v55 = vstv %s2510_s9 }
 0x1ee   :  { %v1660_v52 = vpop.f32.mrf.mxu1 }
 0x1ef   :  { %vm1100_vm12 = vcmp.ge.f32.partialorder %v1069_v9, 0.0  ;;  %v1117_v56 = vmul.f32 %v2322_v41, %v1069_v9  ;;  %v1661_v58 = vadd.f32 %v1660_v52, %v1659_v50 }
 0x1f0   :  { %v1662_v6 = vpop.f32.mrf.mxu1 }
 0x1f1   :  { %v1074_v25 = vadd.f32 %v1661_v58, %v977_v33  ;;  %v1133_v63 = vsel %vm1100_vm12, %v1069_v9, %v1117_v56 }
 0x1f2   :  { %v1663_v22 = vpop.f32.mrf.mxu1  ;;  %v1143_v39 = vpack.c.bf16 %v1133_v63, %v1132_v40 }
 0x1f3   :  { %v1664_v1 = vadd.f32 %v1663_v22, %v1662_v6  ;;  %v1118_v3 = vmul.f32 %v2322_v41, %v1074_v25  ;;  %vm1101_vm13 = vcmp.ge.f32.partialorder %v1074_v25, 0.0 }
 0x1f4   :  { %v1665_v61 = vpop.f32.mrf.mxu1  ;;  %1712 = vmatmul.mubr.bf16.gmra.mxu0 %v1143_v39 }
 0x1f5   :  { %v1077_v4 = vadd.f32 %v1664_v1, %v980_v59  ;;  %v1134_v19 = vsel %vm1101_vm13, %v1074_v25, %v1118_v3 }
 0x1f6   :  { %v1666_v7 = vpop.f32.mrf.mxu1 }
 0x1f7   :  { %vm1102_vm14 = vcmp.ge.f32.partialorder %v1077_v4, 0.0  ;;  %v1119_v11 = vmul.f32 %v2322_v41, %v1077_v4  ;;  %v1667_v16 = vadd.f32 %v1666_v7, %v1665_v61 }
 0x1f8   :  { %v1668_v18 = vpop.f32.mrf.mxu1 }
 0x1f9   :  { %v1082_v44 = vadd.f32 %v1667_v16, %v985_v5  ;;  %v1135_v38 = vsel %vm1102_vm14, %v1077_v4, %v1119_v11 }
 0x1fa   :  { %v1669_v20 = vpop.f32.mrf.mxu1  ;;  %v1144_v17 = vpack.c.bf16 %v1135_v38, %v1134_v19 }
 0x1fb   :  { %v1670_v24 = vadd.f32 %v1669_v20, %v1668_v18  ;;  %v1120_v28 = vmul.f32 %v2322_v41, %v1082_v44  ;;  %vm1103_vm15 = vcmp.ge.f32.partialorder %v1082_v44, 0.0 }
 0x1fc   :  { %1715 = vmatprep.mubr.bf16.mxu0 %v1144_v17 }
 0x1fd   :  { %v1085_v29 = vadd.f32 %v1670_v24, %v988_v21  ;;  %v1136_v57 = vsel %vm1103_vm15, %v1082_v44, %v1120_v28 }
 0x1ff   :  { %vm1104_vm0 = vcmp.ge.f32.partialorder %v1085_v29, 0.0  ;;  %v1121_v27 = vmul.f32 %v2322_v41, %v1085_v29 }
 0x201   :  { %v1137_v14 = vsel %vm1104_vm0, %v1085_v29, %v1121_v27 }
 0x202   :  { %v1145_v23 = vpack.c.bf16 %v1137_v14, %v1136_v57 }
 0x204   :  { %1716 = vmatmul.mubr.bf16.gmra.mxu0 %v1145_v23 }
 0x292   :  { %v1705_v32 = vpop.f32.mrf.mxu0 }
 0x293   :  { %v1260_v26 = vadd.f32 %v1705_v32, %v2358_v30 }
 0x294   :  { %v1251_v35 = vpop.f32.mrf.mxu0 }
 0x295   :  { %v1334_v41 = vmul.f32 %v2363_v55, %v1260_v26  ;;  %v1252_v54 = vadd.f32 %v2358_v30, %v1251_v35  ;;  %vm1317_vm1 = vcmp.ge.f32.partialorder %v1260_v26, 0.0 }
 0x296   :  { %v1706_v31 = vpop.f32.mrf.mxu0 }
 0x297   :  { %v1332_v49 = vmul.f32 %v2363_v55, %v1252_v54  ;;  %v1263_v0 = vadd.f32 %v1706_v31, %v2358_v30  ;;  %v1350_v47 = vsel %vm1317_vm1, %v1260_v26, %v1334_v41  ;;  %vm1315_vm3 = vcmp.ge.f32.partialorder %v1252_v54, 0.0 }
 0x298   :  { %v1254_v46 = vpop.f32.mrf.mxu0  ;;  %v1373_v37 = vmul.f32 %v2371_v10, %v1350_v47 }
 0x299   :  { %vm1318_vm4 = vcmp.ge.f32.partialorder %v1263_v0, 0.0  ;;  %v1335_v62 = vmul.f32 %v2363_v55, %v1263_v0  ;;  %v1255_v13 = vadd.f32 %v2358_v30, %v1254_v46  ;;  %v1348_v36 = vsel %vm1315_vm3, %v1252_v54, %v1332_v49 }
 0x29a   :  { %v1394_v42 = vsel %vm1387_vm2, %v1373_v37, 0.0  ;;  %v1371_v53 = vmul.f32 %v2371_v10, %v1348_v36  ;;  %vm1454_vm3 = vcmask 7168  }
 0x29b   :  { %vm1316_vm5 = vcmp.ge.f32.partialorder %v1255_v13, 0.0  ;;  %v1333_v12 = vmul.f32 %v2363_v55, %v1255_v13  ;;  %1395 = vadd.xlane.f32.xlu1 %v1394_v42  ;;  %v1351_v43 = vsel %vm1318_vm4, %v1263_v0, %v1335_v62 }
 0x29c   :  { %v1388_v45 = vsel %vm1387_vm2, %v1371_v53, 0.0  ;;  %v1374_v48 = vmul.f32 %v2371_v10, %v1351_v43 }
 0x29d   :  { %1389 = vadd.xlane.f32.xlu0 %v1388_v45  ;;  %v1349_v50 = vsel %vm1316_vm5, %v1255_v13, %v1333_v12 }
 0x29e   :  { %v1397_v51 = vsel %vm1387_vm2, %v1374_v48, 0.0  ;;  %v1372_v9 = vmul.f32 %v2371_v10, %v1349_v50 }
 0x29f   :  { %1398 = vadd.xlane.f32.xlu1 %v1397_v51 }
 0x2a0   :  { %v1391_v33 = vsel %vm1387_vm2, %v1372_v9, 0.0 }
 0x2a1   :  { %1392 = vadd.xlane.f32.xlu0 %v1391_v33 }
 0x2a4   :  { %v1709_v52 = vpop.f32.mrf.mxu0 }
 0x2a5   :  { %v1276_v34 = vadd.f32 %v1709_v52, %v2358_v30 }
 0x2a6   :  { %v1267_v56 = vpop.f32.mrf.mxu0 }
 0x2a7   :  { %vm1321_vm6 = vcmp.ge.f32.partialorder %v1276_v34, 0.0  ;;  %v1338_v58 = vmul.f32 %v2363_v55, %v1276_v34  ;;  %v1268_v60 = vadd.f32 %v2358_v30, %v1267_v56 }
 0x2a8   :  { %v1710_v6 = vpop.f32.mrf.mxu0 }
 0x2a9   :  { %vm1319_vm7 = vcmp.ge.f32.partialorder %v1268_v60, 0.0  ;;  %v1336_v25 = vmul.f32 %v2363_v55, %v1268_v60  ;;  %v1279_v40 = vadd.f32 %v1710_v6, %v2358_v30  ;;  %v1354_v63 = vsel %vm1321_vm6, %v1276_v34, %v1338_v58 }
 0x2aa   :  { %v1270_v15 = vpop.f32.mrf.mxu0  ;;  %v1377_v22 = vmul.f32 %v2371_v10, %v1354_v63 }
 0x2ab   :  { %vm1322_vm8 = vcmp.ge.f32.partialorder %v1279_v40, 0.0  ;;  %v1339_v39 = vmul.f32 %v2363_v55, %v1279_v40  ;;  %v1271_v59 = vadd.f32 %v2358_v30, %v1270_v15  ;;  %v1352_v1 = vsel %vm1319_vm7, %v1268_v60, %v1336_v25 }
 0x2ac   :  { %v1406_v2 = vsel %vm1387_vm2, %v1377_v22, 0.0  ;;  %v1375_v61 = vmul.f32 %v2371_v10, %v1352_v1 }
 0x2ad   :  { %vm1320_vm9 = vcmp.ge.f32.partialorder %v1271_v59, 0.0  ;;  %v1337_v3 = vmul.f32 %v2363_v55, %v1271_v59  ;;  %1407 = vadd.xlane.f32.xlu0 %v1406_v2  ;;  %v1355_v4 = vsel %vm1322_vm8, %v1279_v40, %v1339_v39 }
 0x2ae   :  { %v1378_v5 = vmul.f32 %v2371_v10, %v1355_v4  ;;  %v1400_v11 = vsel %vm1387_vm2, %v1375_v61, 0.0 }
 0x2af   :  { %v1353_v7 = vsel %vm1320_vm9, %v1271_v59, %v1337_v3 }
 0x2b0   :  { %v1409_v8 = vsel %vm1387_vm2, %v1378_v5, 0.0  ;;  %v1376_v16 = vmul.f32 %v2371_v10, %v1353_v7 }
 0x2b1   :  { %1410 = vadd.xlane.f32.xlu1 %v1409_v8  ;;  %1401 = vadd.xlane.f32.xlu0 %v1400_v11 }
 0x2b2   :  { %v1403_v44 = vsel %vm1387_vm2, %v1376_v16, 0.0 }
 0x2b4   :  { %v1713_v18 = vpop.f32.mrf.mxu0 }
 0x2b5   :  { %v1292_v19 = vadd.f32 %v1713_v18, %v2358_v30  ;;  %1404 = vadd.xlane.f32.xlu1 %v1403_v44 }
 0x2b6   :  { %v1283_v38 = vpop.f32.mrf.mxu0 }
 0x2b7   :  { %vm1325_vm11 = vcmp.ge.f32.partialorder %v1292_v19, 0.0  ;;  %v1342_v20 = vmul.f32 %v2363_v55, %v1292_v19  ;;  %v1284_v17 = vadd.f32 %v2358_v30, %v1283_v38 }
 0x2b8   :  { %v1714_v21 = vpop.f32.mrf.mxu0 }
 0x2b9   :  { %vm1323_vm10 = vcmp.ge.f32.partialorder %v1284_v17, 0.0  ;;  %v1340_v24 = vmul.f32 %v2363_v55, %v1284_v17  ;;  %v1295_v28 = vadd.f32 %v1714_v21, %v2358_v30  ;;  %v1358_v29 = vsel %vm1325_vm11, %v1292_v19, %v1342_v20 }
 0x2ba   :  { %v1286_v27 = vpop.f32.mrf.mxu0  ;;  %v1381_v57 = vmul.f32 %v2371_v10, %v1358_v29 }
 0x2bb   :  { %vm1326_vm12 = vcmp.ge.f32.partialorder %v1295_v28, 0.0  ;;  %v1343_v14 = vmul.f32 %v2363_v55, %v1295_v28  ;;  %v1287_v23 = vadd.f32 %v2358_v30, %v1286_v27  ;;  %v1356_v32 = vsel %vm1323_vm10, %v1284_v17, %v1340_v24 }
 0x2bc   :  { %v1418_v26 = vsel %vm1387_vm2, %v1381_v57, 0.0  ;;  %v1379_v35 = vmul.f32 %v2371_v10, %v1356_v32 }
 0x2bd   :  { %vm1324_vm13 = vcmp.ge.f32.partialorder %v1287_v23, 0.0  ;;  %v1341_v41 = vmul.f32 %v2363_v55, %v1287_v23  ;;  %1419 = vadd.xlane.f32.xlu0 %v1418_v26  ;;  %v1359_v54 = vsel %vm1326_vm12, %v1295_v28, %v1343_v14 }
 0x2be   :  { %v1382_v31 = vmul.f32 %v2371_v10, %v1359_v54  ;;  %v1412_v47 = vsel %vm1387_vm2, %v1379_v35, 0.0 }
 0x2bf   :  { %v1357_v49 = vsel %vm1324_vm13, %v1287_v23, %v1341_v41 }
 0x2c0   :  { %v1421_v0 = vsel %vm1387_vm2, %v1382_v31, 0.0  ;;  %v1380_v46 = vmul.f32 %v2371_v10, %v1357_v49 }
 0x2c1   :  { %1422 = vadd.xlane.f32.xlu1 %v1421_v0  ;;  %1413 = vadd.xlane.f32.xlu0 %v1412_v47 }
 0x2c2   :  { %v1415_v62 = vsel %vm1387_vm2, %v1380_v46, 0.0 }
 0x2c4   :  { %v1717_v37 = vpop.f32.mrf.mxu0 }
 0x2c5   :  { %v1308_v13 = vadd.f32 %v1717_v37, %v2358_v30  ;;  %1416 = vadd.xlane.f32.xlu1 %v1415_v62 }
 0x2c6   :  { %v1299_v36 = vpop.f32.mrf.mxu0 }
 0x2c7   :  { %v1346_v42 = vmul.f32 %v2363_v55, %v1308_v13  ;;  %v1300_v53 = vadd.f32 %v2358_v30, %v1299_v36  ;;  %vm1329_vm14 = vcmp.ge.f32.partialorder %v1308_v13, 0.0 }
 0x2c8   :  { %v1718_v12 = vpop.f32.mrf.mxu0 }
 0x2c9   :  { %vm1327_vm15 = vcmp.ge.f32.partialorder %v1300_v53, 0.0  ;;  %v1344_v43 = vmul.f32 %v2363_v55, %v1300_v53  ;;  %v1311_v45 = vadd.f32 %v1718_v12, %v2358_v30  ;;  %v1362_v33 = vsel %vm1329_vm14, %v1308_v13, %v1346_v42 }
 0x2ca   :  { %v1302_v48 = vpop.f32.mrf.mxu0  ;;  %v1385_v58 = vmul.f32 %v2371_v10, %v1362_v33 }
 0x2cb   :  { %v1347_v50 = vmul.f32 %v2363_v55, %v1311_v45  ;;  %v1303_v51 = vadd.f32 %v2358_v30, %v1302_v48  ;;  %v1360_v9 = vsel %vm1327_vm15, %v1300_v53, %v1344_v43  ;;  %vm1330_vm0 = vcmp.ge.f32.partialorder %v1311_v45, 0.0 }
 0x2cc   :  { %v1383_v52 = vmul.f32 %v2371_v10, %v1360_v9  ;;  %v1430_v30 = vsel %vm1387_vm2, %v1385_v58, 0.0 }
 0x2cd   :  { %vm1328_vm1 = vcmp.ge.f32.partialorder %v1303_v51, 0.0  ;;  %v1345_v34 = vmul.f32 %v2363_v55, %v1303_v51  ;;  %v1363_v6 = vsel %vm1330_vm0, %v1311_v45, %v1347_v50  ;;  %v1437_v55 = vstv %s2512_s11 }
 0x2ce   :  { %v1424_v56 = vsel %vm1387_vm2, %v1383_v52, 0.0  ;;  %v1386_v63 = vmul.f32 %v2371_v10, %v1363_v6 }
 0x2cf   :  { %1425 = vadd.xlane.f32.xlu0 %v1424_v56  ;;  %v1361_v60 = vsel %vm1328_vm1, %v1303_v51, %v1345_v34 }
 0x2d0   :  { %v1384_v25 = vmul.f32 %v2371_v10, %v1361_v60  ;;  %v1433_v15 = vsel %vm1387_vm2, %v1386_v63, 0.0 }
 0x2d2   :  { %v1427_v40 = vsel %vm1387_vm2, %v1384_v25, 0.0 }
 0x2d3   :  { %1428 = vadd.xlane.f32.xlu1 %v1427_v40  ;;  %1431 = vadd.xlane.f32.xlu0 %v1430_v30 }
 0x2d7   :  { %1434 = vadd.xlane.f32.xlu1 %v1433_v15 }
 0x324   :  { %v1396_v22 = vpop.xlane.xlu1 %1395 }
 0x325   :  { %v1440_v39 = vadd.f32 %v1437_v55, %v1396_v22 }
 0x326   :  { %v1390_v59 = vpop.xlane.xlu0 %1389 }
 0x327   :  { %1457 = vst.msk [vmem:[%s2513_s12 + $0x10] sm:$0xff] %vm1454_vm3, %v1440_v39  ;;  %v1438_v1 = vadd.f32 %v1437_v55, %v1390_v59 }
 0x328   :  { %v1399_v10 = vpop.xlane.xlu1 %1398 }
 0x329   :  { %1455 = vst.msk [vmem:[%s2513_s12] sm:$0xff] %vm1454_vm3, %v1438_v1  ;;  %v1441_v2 = vadd.f32 %v1437_v55, %v1399_v10 }
 0x32a   :  { %v1393_v61 = vpop.xlane.xlu0 %1392 }
 0x32b   :  { %1458 = vst.msk [vmem:[%s2513_s12 + $0x18] sm:$0xff] %vm1454_vm3, %v1441_v2  ;;  %v1439_v3 = vadd.f32 %v1437_v55, %v1393_v61 }
 0x32d   :  { %1456 = vst.msk [vmem:[%s2513_s12 + $0x8] sm:$0xff] %vm1454_vm3, %v1439_v3 }
 0x336   :  { %v1408_v4 = vpop.xlane.xlu0 %1407 }
 0x337   :  { %v1444_v5 = vadd.f32 %v1437_v55, %v1408_v4 }
 0x339   :  { %1461 = vst.msk [vmem:[%s2513_s12 + $0x30] sm:$0xff] %vm1454_vm3, %v1444_v5 }
 0x33a   :  { %v1411_v7 = vpop.xlane.xlu1 %1410  ;;  %v1402_v8 = vpop.xlane.xlu0 %1401 }
 0x33b   :  { %v1445_v11 = vadd.f32 %v1437_v55, %v1411_v7  ;;  %v1442_v16 = vadd.f32 %v1437_v55, %v1402_v8 }
 0x33d   :  { %1462 = vst.msk [vmem:[%s2513_s12 + $0x38] sm:$0xff] %vm1454_vm3, %v1445_v11  ;;  %1459 = vst.msk [vmem:[%s2513_s12 + $0x20] sm:$0xff] %vm1454_vm3, %v1442_v16 }
 0x33e   :  { %v1405_v18 = vpop.xlane.xlu1 %1404 }
 0x33f   :  { %v1443_v44 = vadd.f32 %v1437_v55, %v1405_v18 }
 0x341   :  { %1460 = vst.msk [vmem:[%s2513_s12 + $0x28] sm:$0xff] %vm1454_vm3, %v1443_v44 }
 0x346   :  { %v1420_v19 = vpop.xlane.xlu0 %1419 }
 0x347   :  { %v1448_v38 = vadd.f32 %v1437_v55, %v1420_v19 }
 0x349   :  { %1465 = vst.msk [vmem:[%s2513_s12 + $0x50] sm:$0xff] %vm1454_vm3, %v1448_v38 }
 0x34a   :  { %v1423_v20 = vpop.xlane.xlu1 %1422  ;;  %v1414_v17 = vpop.xlane.xlu0 %1413 }
 0x34b   :  { %v1449_v21 = vadd.f32 %v1437_v55, %v1423_v20  ;;  %v1446_v24 = vadd.f32 %v1437_v55, %v1414_v17 }
 0x34d   :  { %1466 = vst.msk [vmem:[%s2513_s12 + $0x58] sm:$0xff] %vm1454_vm3, %v1449_v21  ;;  %1463 = vst.msk [vmem:[%s2513_s12 + $0x40] sm:$0xff] %vm1454_vm3, %v1446_v24 }
 0x34e   :  { %v1417_v28 = vpop.xlane.xlu1 %1416 }
 0x34f   :  { %v1447_v29 = vadd.f32 %v1437_v55, %v1417_v28 }
 0x351   :  { %1464 = vst.msk [vmem:[%s2513_s12 + $0x48] sm:$0xff] %vm1454_vm3, %v1447_v29 }
 0x358   :  { %v1426_v27 = vpop.xlane.xlu0 %1425 }
 0x359   :  { %v1450_v57 = vadd.f32 %v1437_v55, %v1426_v27 }
 0x35b   :  { %1467 = vst.msk [vmem:[%s2513_s12 + $0x60] sm:$0xff] %vm1454_vm3, %v1450_v57 }
 0x35c   :  { %v1429_v14 = vpop.xlane.xlu1 %1428  ;;  %v1432_v23 = vpop.xlane.xlu0 %1431 }
 0x35d   :  { %v1451_v32 = vadd.f32 %v1437_v55, %v1429_v14  ;;  %v1452_v26 = vadd.f32 %v1437_v55, %v1432_v23 }
 0x35f   :  { %1468 = vst.msk [vmem:[%s2513_s12 + $0x68] sm:$0xff] %vm1454_vm3, %v1451_v32  ;;  %1469 = vst.msk [vmem:[%s2513_s12 + $0x70] sm:$0xff] %vm1454_vm3, %v1452_v26 }
 0x360   :  { %v1435_v35 = vpop.xlane.xlu1 %1434 }
 0x361   :  { %v1453_v41 = vadd.f32 %v1437_v55, %v1435_v35 }
 0x363   :  { %1470 = vst.msk [vmem:[%s2513_s12 + $0x78] sm:$0xff] %vm1454_vm3, %v1453_v41 }
 0x364   :  { %1475 = vsyncpa [#allocation7], 1 }

</bundles_post_ra>
